<compile_context>
chip_gen: v7x
topology: tpu7x:2x2x1
jax: 0.10.0
libtpu: 0.0.40
codegen_flags: <defaults>
</compile_context>

<pallas_src>
import numpy as np
import jax
import jax.numpy as jnp
from jax.experimental import pallas as pl
from jax.experimental.pallas import tpu as pltpu

LANE = 128  # lane-tile width; each gate occupies its own 128-lane block


def _sigmoid(v):
    # Exact identity sigma(x) = 0.5 * (tanh(x/2) + 1): single EUP op, no VPU divide.
    return 0.5 * (jnp.tanh(0.5 * v) + 1.0)


def bgru_kernel(x_ref,
                wih_f_ref, whh_f_ref, bx_f_ref, bhn_f_ref,
                wih_b_ref, whh_b_ref, bx_b_ref, bhn_b_ref,
                wout_f_ref, wout_b_ref, bout_ref,
                out_ref,
                gf_ref, gb_ref):
    T, H = gf_ref.shape
    x = x_ref[...]                                            # (T, E)

    # Fused input projections for ALL timesteps (one matmul per direction),
    # biases (b_ih + r/z parts of b_hh) pre-folded into bx.
    gx_f = jnp.dot(x, wih_f_ref[...], preferred_element_type=jnp.float32) + bx_f_ref[...]
    gx_b = jnp.dot(x, wih_b_ref[...], preferred_element_type=jnp.float32) + bx_b_ref[...]

    def gate_cols(gx):  # lane-tile-aligned static slices -> three (T, H) blocks
        return (gx[:, 0:H], gx[:, LANE:LANE + H], gx[:, 2 * LANE:2 * LANE + H])

    xr_f, xz_f, xn_f = gate_cols(gx_f)
    xr_b, xz_b, xn_b = gate_cols(gx_b)

    whh_f = whh_f_ref[...]        # (H, 3*LANE)  gates packed along lane blocks
    whh_b = whh_b_ref[...]
    bhn_f = bhn_f_ref[...]        # (1, H)  recurrent bias of the n gate
    bhn_b = bhn_b_ref[...]

    def cell(h, xr, xz, xn, whh, bhn):
        # ONE fused (1,H) @ (H,3*LANE) matmul for all three gates.
        gh = jnp.dot(h, whh, preferred_element_type=jnp.float32)   # (1, 3*LANE)
        r = _sigmoid(xr + gh[:, 0:H])
        z = _sigmoid(xz + gh[:, LANE:LANE + H])
        n = jnp.tanh(xn + r * (gh[:, 2 * LANE:2 * LANE + H] + bhn))
        return (1.0 - z) * n + z * h

    h_f = jnp.zeros((1, H), jnp.float32)
    h_b = jnp.zeros((1, H), jnp.float32)

    # Fully unrolled (T is small and static); forward and backward chains are
    # interleaved so two independent recurrences are in flight each iteration.
    # Hidden-state writebacks use static indices and are off the critical path.
    for i in range(T):
        tb = T - 1 - i
        h_f = cell(h_f, xr_f[i:i + 1], xz_f[i:i + 1], xn_f[i:i + 1], whh_f, bhn_f)
        h_b = cell(h_b, xr_b[tb:tb + 1], xz_b[tb:tb + 1], xn_b[tb:tb + 1], whh_b, bhn_b)
        gf_ref[i:i + 1, :] = h_f
        gb_ref[tb:tb + 1, :] = h_b

    # hidden2tag: concat(fwd, bwd) @ W.T + b  ==  gf @ W_f + gb @ W_b + b
    # TODO(synk): on v7x the two directions could be split across the 2 TensorCores
    # (grid=(2,) parallel) for ~2x; kept single-invocation for portability.
    out_ref[...] = (
        jnp.dot(gf_ref[...], wout_f_ref[...], preferred_element_type=jnp.float32)
        + jnp.dot(gb_ref[...], wout_b_ref[...], preferred_element_type=jnp.float32)
        + bout_ref[...]).astype(out_ref.dtype)


@jax.jit
def bgru_tagger(x, p):
    T = x.shape[0]
    H = p["whh_f"].shape[0]
    TAG = p["bout"].shape[1]
    vmem = pl.BlockSpec(memory_space=pltpu.MemorySpace.VMEM)
    return pl.pallas_call(
        bgru_kernel,
        out_shape=jax.ShapeDtypeStruct((T, TAG), jnp.float32),
        in_specs=[vmem] * 12,
        out_specs=vmem,
        scratch_shapes=[pltpu.VMEM((T, H), jnp.float32),   # forward hidden states
                        pltpu.VMEM((T, H), jnp.float32)],  # backward hidden states
    )(x,
      p["wih_f"], p["whh_f"], p["bx_f"], p["bhn_f"],
      p["wih_b"], p["whh_b"], p["bx_b"], p["bhn_b"],
      p["wout_f"], p["wout_b"], p["bout"])


def init_raw_params(key, E, H, TAG):
    """Deterministic init matching nn.GRU / nn.Linear parameter shapes/layout."""
    k = 1.0 / np.sqrt(H)
    kl = 1.0 / np.sqrt(2 * H)
    keys = jax.random.split(key, 10)
    u = lambda kk, shape, lim: jax.random.uniform(kk, shape, jnp.float32, -lim, lim)
    return dict(
        # PyTorch layout: weight_ih (3H, E), weight_hh (3H, H), biases (3H,), gates [r,z,n]
        w_ih_f=u(keys[0], (3 * H, E), k), w_hh_f=u(keys[1], (3 * H, H), k),
        b_ih_f=u(keys[2], (3 * H,), k),   b_hh_f=u(keys[3], (3 * H,), k),
        w_ih_b=u(keys[4], (3 * H, E), k), w_hh_b=u(keys[5], (3 * H, H), k),
        b_ih_b=u(keys[6], (3 * H,), k),   b_hh_b=u(keys[7], (3 * H,), k),
        w_out=u(keys[8], (TAG, 2 * H), kl), b_out=u(keys[9], (TAG,), kl),
    )


def pack_params(raw, E, H, TAG):
    """Re-pack PyTorch-layout weights into the lane-padded kernel layout.

    wih: (E, 3*128), whh: (H, 3*128) with gate g occupying lanes [g*128, g*128+H)
    (padded lanes zero); bx: (1, 3*128) = [b_ir+b_hr | b_iz+b_hz | b_in];
    bhn: (1, H) = b_hn; wout split per direction as (H, TAG).
    """
    r = {k: np.asarray(v, np.float32) for k, v in raw.items()}
    G = 3 * LANE

    def pack_dir(w_ih, w_hh, b_ih, b_hh):
        wih = np.zeros((E, G), np.float32)
        whh = np.zeros((H, G), np.float32)
        bx = np.zeros((1, G), np.float32)
        for g in range(3):
            wih[:, g * LANE:g * LANE + H] = w_ih[g * H:(g + 1) * H, :].T
            whh[:, g * LANE:g * LANE + H] = w_hh[g * H:(g + 1) * H, :].T
        bx[0, 0:H] = b_ih[0:H] + b_hh[0:H]                          # r
        bx[0, LANE:LANE + H] = b_ih[H:2 * H] + b_hh[H:2 * H]        # z
        bx[0, 2 * LANE:2 * LANE + H] = b_ih[2 * H:3 * H]            # n (input part only)
        bhn = b_hh[2 * H:3 * H].reshape(1, H)
        return wih, whh, bx, bhn

    wih_f, whh_f, bx_f, bhn_f = pack_dir(r["w_ih_f"], r["w_hh_f"], r["b_ih_f"], r["b_hh_f"])
    wih_b, whh_b, bx_b, bhn_b = pack_dir(r["w_ih_b"], r["w_hh_b"], r["b_ih_b"], r["b_hh_b"])

    packed = dict(
        wih_f=wih_f, whh_f=whh_f, bx_f=bx_f, bhn_f=bhn_f,
        wih_b=wih_b, whh_b=whh_b, bx_b=bx_b, bhn_b=bhn_b,
        wout_f=np.ascontiguousarray(r["w_out"][:, :H].T),   # (H, TAG)
        wout_b=np.ascontiguousarray(r["w_out"][:, H:].T),   # (H, TAG)
        bout=r["b_out"].reshape(1, TAG),
    )
    return {k: jnp.asarray(v) for k, v in packed.items()}


def reference_forward(x, raw):
    """Pure numpy reference matching torch.nn.GRU(bidirectional=True) + Linear."""
    x = np.asarray(x)
    p = {k: np.asarray(v) for k, v in raw.items()}
    T = x.shape[0]
    H = p["w_hh_f"].shape[1]
    sig = lambda v: 1.0 / (1.0 + np.exp(-v))

    def run(w_ih, w_hh, b_ih, b_hh, reverse):
        h = np.zeros((H,), np.float32)
        out = np.zeros((T, H), np.float32)
        order = range(T - 1, -1, -1) if reverse else range(T)
        for t in order:
            gi = w_ih @ x[t] + b_ih          # (3H,)
            gh = w_hh @ h + b_hh             # (3H,)
            r = sig(gi[:H] + gh[:H])
            z = sig(gi[H:2 * H] + gh[H:2 * H])
            n = np.tanh(gi[2 * H:] + r * gh[2 * H:])
            h = (1.0 - z) * n + z * h
            out[t] = h
        return out

    gf = run(p["w_ih_f"], p["w_hh_f"], p["b_ih_f"], p["b_hh_f"], False)
    gb = run(p["w_ih_b"], p["w_hh_b"], p["b_ih_b"], p["b_hh_b"], True)
    return np.concatenate([gf, gb], axis=1) @ p["w_out"].T + p["b_out"]


if __name__ == "__main__":
    T, E, H, TAG = 8, 2, 32, 2   # seq=8, EMBEDDING_DIM=2, HIDDEN_DIM=32, TAGSET_SIZE=2
    key = jax.random.PRNGKey(0)
    kx, kp = jax.random.split(key)
    sentence = jax.random.normal(kx, (T, E), jnp.float32)
    raw = init_raw_params(kp, E, H, TAG)
    params = pack_params(raw, E, H, TAG)

    out = jax.block_until_ready(bgru_tagger(sentence, params))

    ref = reference_forward(sentence, raw)
    np.testing.assert_allclose(np.asarray(out), ref, atol=2e-3, rtol=2e-3)
    print("KERNEL_OK")
</pallas_src>

<mosaic_0001>
module attributes {stable_mosaic.version = 11 : i64} {
  func.func @bgru_kernel(%arg0: memref<8x2xf32, #tpu.memory_space<vmem>>, %arg1: memref<2x384xf32, #tpu.memory_space<vmem>>, %arg2: memref<32x384xf32, #tpu.memory_space<vmem>>, %arg3: memref<1x384xf32, #tpu.memory_space<vmem>>, %arg4: memref<1x32xf32, #tpu.memory_space<vmem>>, %arg5: memref<2x384xf32, #tpu.memory_space<vmem>>, %arg6: memref<32x384xf32, #tpu.memory_space<vmem>>, %arg7: memref<1x384xf32, #tpu.memory_space<vmem>>, %arg8: memref<1x32xf32, #tpu.memory_space<vmem>>, %arg9: memref<32x2xf32, #tpu.memory_space<vmem>>, %arg10: memref<32x2xf32, #tpu.memory_space<vmem>>, %arg11: memref<1x2xf32, #tpu.memory_space<vmem>>, %arg12: memref<8x2xf32, #tpu.memory_space<vmem>>, %arg13: memref<8x32xf32, #tpu.memory_space<vmem>>, %arg14: memref<8x32xf32, #tpu.memory_space<vmem>>) attributes {dimension_semantics = [], scalar_prefetch = 0 : i64, scratch_operands = 2 : i64, tpu.core_type = #tpu.core_type<tc>} {
    %c0 = arith.constant 0 : index
    %c0_0 = arith.constant 0 : index
    %0 = vector.load %arg0[%c0, %c0_0] : memref<8x2xf32, #tpu.memory_space<vmem>>, vector<8x2xf32>
    %c0_1 = arith.constant 0 : index
    %c0_2 = arith.constant 0 : index
    %1 = vector.load %arg1[%c0_1, %c0_2] : memref<2x384xf32, #tpu.memory_space<vmem>>, vector<2x384xf32>
    %cst = arith.constant dense<0.000000e+00> : vector<8x384xf32>
    %2 = tpu.matmul %0, %1, %cst {dimension_numbers = #tpu.dot_dimension_numbers<[1], [0], [0], [1], [0, 0, 1, 1], [], []>} : vector<8x2xf32>, vector<2x384xf32>, vector<8x384xf32> -> vector<8x384xf32>
    %c0_3 = arith.constant 0 : index
    %c0_4 = arith.constant 0 : index
    %3 = vector.load %arg3[%c0_3, %c0_4] : memref<1x384xf32, #tpu.memory_space<vmem>>, vector<1x384xf32>
    %4 = vector.broadcast %3 : vector<1x384xf32> to vector<8x384xf32>
    %5 = arith.addf %2, %4 : vector<8x384xf32>
    %c0_5 = arith.constant 0 : index
    %c0_6 = arith.constant 0 : index
    %6 = vector.load %arg5[%c0_5, %c0_6] : memref<2x384xf32, #tpu.memory_space<vmem>>, vector<2x384xf32>
    %cst_7 = arith.constant dense<0.000000e+00> : vector<8x384xf32>
    %7 = tpu.matmul %0, %6, %cst_7 {dimension_numbers = #tpu.dot_dimension_numbers<[1], [0], [0], [1], [0, 0, 1, 1], [], []>} : vector<8x2xf32>, vector<2x384xf32>, vector<8x384xf32> -> vector<8x384xf32>
    %c0_8 = arith.constant 0 : index
    %c0_9 = arith.constant 0 : index
    %8 = vector.load %arg7[%c0_8, %c0_9] : memref<1x384xf32, #tpu.memory_space<vmem>>, vector<1x384xf32>
    %9 = vector.broadcast %8 : vector<1x384xf32> to vector<8x384xf32>
    %10 = arith.addf %7, %9 : vector<8x384xf32>
    %11 = vector.extract_strided_slice %5 {offsets = [0, 0], sizes = [8, 32], strides = [1, 1]} : vector<8x384xf32> to vector<8x32xf32>
    %12 = vector.extract_strided_slice %5 {offsets = [0, 128], sizes = [8, 32], strides = [1, 1]} : vector<8x384xf32> to vector<8x32xf32>
    %13 = vector.extract_strided_slice %5 {offsets = [0, 256], sizes = [8, 32], strides = [1, 1]} : vector<8x384xf32> to vector<8x32xf32>
    %14 = vector.extract_strided_slice %10 {offsets = [0, 0], sizes = [8, 32], strides = [1, 1]} : vector<8x384xf32> to vector<8x32xf32>
    %15 = vector.extract_strided_slice %10 {offsets = [0, 128], sizes = [8, 32], strides = [1, 1]} : vector<8x384xf32> to vector<8x32xf32>
    %16 = vector.extract_strided_slice %10 {offsets = [0, 256], sizes = [8, 32], strides = [1, 1]} : vector<8x384xf32> to vector<8x32xf32>
    %c0_10 = arith.constant 0 : index
    %c0_11 = arith.constant 0 : index
    %17 = vector.load %arg2[%c0_10, %c0_11] : memref<32x384xf32, #tpu.memory_space<vmem>>, vector<32x384xf32>
    %c0_12 = arith.constant 0 : index
    %c0_13 = arith.constant 0 : index
    %18 = vector.load %arg6[%c0_12, %c0_13] : memref<32x384xf32, #tpu.memory_space<vmem>>, vector<32x384xf32>
    %c0_14 = arith.constant 0 : index
    %c0_15 = arith.constant 0 : index
    %19 = vector.load %arg4[%c0_14, %c0_15] : memref<1x32xf32, #tpu.memory_space<vmem>>, vector<1x32xf32>
    %c0_16 = arith.constant 0 : index
    %c0_17 = arith.constant 0 : index
    %20 = vector.load %arg8[%c0_16, %c0_17] : memref<1x32xf32, #tpu.memory_space<vmem>>, vector<1x32xf32>
    %cst_18 = arith.constant 0.000000e+00 : f32
    %21 = vector.broadcast %cst_18 : f32 to vector<1x32xf32>
    %cst_19 = arith.constant 0.000000e+00 : f32
    %22 = vector.broadcast %cst_19 : f32 to vector<1x32xf32>
    %23 = vector.extract_strided_slice %11 {offsets = [0, 0], sizes = [1, 32], strides = [1, 1]} : vector<8x32xf32> to vector<1x32xf32>
    %24 = vector.extract_strided_slice %12 {offsets = [0, 0], sizes = [1, 32], strides = [1, 1]} : vector<8x32xf32> to vector<1x32xf32>
    %25 = vector.extract_strided_slice %13 {offsets = [0, 0], sizes = [1, 32], strides = [1, 1]} : vector<8x32xf32> to vector<1x32xf32>
    %cst_20 = arith.constant dense<0.000000e+00> : vector<1x384xf32>
    %26 = tpu.matmul %21, %17, %cst_20 {dimension_numbers = #tpu.dot_dimension_numbers<[1], [0], [0], [1], [0, 0, 1, 1], [], []>} : vector<1x32xf32>, vector<32x384xf32>, vector<1x384xf32> -> vector<1x384xf32>
    %27 = vector.extract_strided_slice %26 {offsets = [0, 0], sizes = [1, 32], strides = [1, 1]} : vector<1x384xf32> to vector<1x32xf32>
    %28 = arith.addf %23, %27 : vector<1x32xf32>
    %cst_21 = arith.constant 5.000000e-01 : f32
    %29 = vector.broadcast %cst_21 : f32 to vector<1x32xf32>
    %30 = arith.mulf %29, %28 : vector<1x32xf32>
    %31 = math.tanh %30 : vector<1x32xf32>
    %cst_22 = arith.constant 1.000000e+00 : f32
    %32 = vector.broadcast %cst_22 : f32 to vector<1x32xf32>
    %33 = arith.addf %31, %32 : vector<1x32xf32>
    %cst_23 = arith.constant 5.000000e-01 : f32
    %34 = vector.broadcast %cst_23 : f32 to vector<1x32xf32>
    %35 = arith.mulf %34, %33 : vector<1x32xf32>
    %36 = vector.extract_strided_slice %26 {offsets = [0, 128], sizes = [1, 32], strides = [1, 1]} : vector<1x384xf32> to vector<1x32xf32>
    %37 = arith.addf %24, %36 : vector<1x32xf32>
    %cst_24 = arith.constant 5.000000e-01 : f32
    %38 = vector.broadcast %cst_24 : f32 to vector<1x32xf32>
    %39 = arith.mulf %38, %37 : vector<1x32xf32>
    %40 = math.tanh %39 : vector<1x32xf32>
    %cst_25 = arith.constant 1.000000e+00 : f32
    %41 = vector.broadcast %cst_25 : f32 to vector<1x32xf32>
    %42 = arith.addf %40, %41 : vector<1x32xf32>
    %cst_26 = arith.constant 5.000000e-01 : f32
    %43 = vector.broadcast %cst_26 : f32 to vector<1x32xf32>
    %44 = arith.mulf %43, %42 : vector<1x32xf32>
    %45 = vector.extract_strided_slice %26 {offsets = [0, 256], sizes = [1, 32], strides = [1, 1]} : vector<1x384xf32> to vector<1x32xf32>
    %46 = arith.addf %45, %19 : vector<1x32xf32>
    %47 = arith.mulf %35, %46 : vector<1x32xf32>
    %48 = arith.addf %25, %47 : vector<1x32xf32>
    %49 = math.tanh %48 : vector<1x32xf32>
    %cst_27 = arith.constant 1.000000e+00 : f32
    %50 = vector.broadcast %cst_27 : f32 to vector<1x32xf32>
    %51 = arith.subf %50, %44 : vector<1x32xf32>
    %52 = arith.mulf %51, %49 : vector<1x32xf32>
    %53 = arith.mulf %44, %21 : vector<1x32xf32>
    %54 = arith.addf %52, %53 : vector<1x32xf32>
    %55 = vector.extract_strided_slice %14 {offsets = [7, 0], sizes = [1, 32], strides = [1, 1]} : vector<8x32xf32> to vector<1x32xf32>
    %56 = vector.extract_strided_slice %15 {offsets = [7, 0], sizes = [1, 32], strides = [1, 1]} : vector<8x32xf32> to vector<1x32xf32>
    %57 = vector.extract_strided_slice %16 {offsets = [7, 0], sizes = [1, 32], strides = [1, 1]} : vector<8x32xf32> to vector<1x32xf32>
    %cst_28 = arith.constant dense<0.000000e+00> : vector<1x384xf32>
    %58 = tpu.matmul %22, %18, %cst_28 {dimension_numbers = #tpu.dot_dimension_numbers<[1], [0], [0], [1], [0, 0, 1, 1], [], []>} : vector<1x32xf32>, vector<32x384xf32>, vector<1x384xf32> -> vector<1x384xf32>
    %59 = vector.extract_strided_slice %58 {offsets = [0, 0], sizes = [1, 32], strides = [1, 1]} : vector<1x384xf32> to vector<1x32xf32>
    %60 = arith.addf %55, %59 : vector<1x32xf32>
    %cst_29 = arith.constant 5.000000e-01 : f32
    %61 = vector.broadcast %cst_29 : f32 to vector<1x32xf32>
    %62 = arith.mulf %61, %60 : vector<1x32xf32>
    %63 = math.tanh %62 : vector<1x32xf32>
    %cst_30 = arith.constant 1.000000e+00 : f32
    %64 = vector.broadcast %cst_30 : f32 to vector<1x32xf32>
    %65 = arith.addf %63, %64 : vector<1x32xf32>
    %cst_31 = arith.constant 5.000000e-01 : f32
    %66 = vector.broadcast %cst_31 : f32 to vector<1x32xf32>
    %67 = arith.mulf %66, %65 : vector<1x32xf32>
    %68 = vector.extract_strided_slice %58 {offsets = [0, 128], sizes = [1, 32], strides = [1, 1]} : vector<1x384xf32> to vector<1x32xf32>
    %69 = arith.addf %56, %68 : vector<1x32xf32>
    %cst_32 = arith.constant 5.000000e-01 : f32
    %70 = vector.broadcast %cst_32 : f32 to vector<1x32xf32>
    %71 = arith.mulf %70, %69 : vector<1x32xf32>
    %72 = math.tanh %71 : vector<1x32xf32>
    %cst_33 = arith.constant 1.000000e+00 : f32
    %73 = vector.broadcast %cst_33 : f32 to vector<1x32xf32>
    %74 = arith.addf %72, %73 : vector<1x32xf32>
    %cst_34 = arith.constant 5.000000e-01 : f32
    %75 = vector.broadcast %cst_34 : f32 to vector<1x32xf32>
    %76 = arith.mulf %75, %74 : vector<1x32xf32>
    %77 = vector.extract_strided_slice %58 {offsets = [0, 256], sizes = [1, 32], strides = [1, 1]} : vector<1x384xf32> to vector<1x32xf32>
    %78 = arith.addf %77, %20 : vector<1x32xf32>
    %79 = arith.mulf %67, %78 : vector<1x32xf32>
    %80 = arith.addf %57, %79 : vector<1x32xf32>
    %81 = math.tanh %80 : vector<1x32xf32>
    %cst_35 = arith.constant 1.000000e+00 : f32
    %82 = vector.broadcast %cst_35 : f32 to vector<1x32xf32>
    %83 = arith.subf %82, %76 : vector<1x32xf32>
    %84 = arith.mulf %83, %81 : vector<1x32xf32>
    %85 = arith.mulf %76, %22 : vector<1x32xf32>
    %86 = arith.addf %84, %85 : vector<1x32xf32>
    %c0_36 = arith.constant 0 : index
    %c0_37 = arith.constant 0 : index
    %87 = vector.load %arg13[%c0_36, %c0_37] : memref<8x32xf32, #tpu.memory_space<vmem>>, vector<1x32xf32>
    tpu.vector_store %arg13[%c0_36, %c0_37], %54 {strides = array<i32>} : memref<8x32xf32, #tpu.memory_space<vmem>>, vector<1x32xf32>,
    %c7 = arith.constant 7 : index
    %c0_38 = arith.constant 0 : index
    %88 = vector.load %arg14[%c7, %c0_38] : memref<8x32xf32, #tpu.memory_space<vmem>>, vector<1x32xf32>
    tpu.vector_store %arg14[%c7, %c0_38], %86 {strides = array<i32>} : memref<8x32xf32, #tpu.memory_space<vmem>>, vector<1x32xf32>,
    %89 = vector.extract_strided_slice %11 {offsets = [1, 0], sizes = [1, 32], strides = [1, 1]} : vector<8x32xf32> to vector<1x32xf32>
    %90 = vector.extract_strided_slice %12 {offsets = [1, 0], sizes = [1, 32], strides = [1, 1]} : vector<8x32xf32> to vector<1x32xf32>
    %91 = vector.extract_strided_slice %13 {offsets = [1, 0], sizes = [1, 32], strides = [1, 1]} : vector<8x32xf32> to vector<1x32xf32>
    %cst_39 = arith.constant dense<0.000000e+00> : vector<1x384xf32>
    %92 = tpu.matmul %54, %17, %cst_39 {dimension_numbers = #tpu.dot_dimension_numbers<[1], [0], [0], [1], [0, 0, 1, 1], [], []>} : vector<1x32xf32>, vector<32x384xf32>, vector<1x384xf32> -> vector<1x384xf32>
    %93 = vector.extract_strided_slice %92 {offsets = [0, 0], sizes = [1, 32], strides = [1, 1]} : vector<1x384xf32> to vector<1x32xf32>
    %94 = arith.addf %89, %93 : vector<1x32xf32>
    %cst_40 = arith.constant 5.000000e-01 : f32
    %95 = vector.broadcast %cst_40 : f32 to vector<1x32xf32>
    %96 = arith.mulf %95, %94 : vector<1x32xf32>
    %97 = math.tanh %96 : vector<1x32xf32>
    %cst_41 = arith.constant 1.000000e+00 : f32
    %98 = vector.broadcast %cst_41 : f32 to vector<1x32xf32>
    %99 = arith.addf %97, %98 : vector<1x32xf32>
    %cst_42 = arith.constant 5.000000e-01 : f32
    %100 = vector.broadcast %cst_42 : f32 to vector<1x32xf32>
    %101 = arith.mulf %100, %99 : vector<1x32xf32>
    %102 = vector.extract_strided_slice %92 {offsets = [0, 128], sizes = [1, 32], strides = [1, 1]} : vector<1x384xf32> to vector<1x32xf32>
    %103 = arith.addf %90, %102 : vector<1x32xf32>
    %cst_43 = arith.constant 5.000000e-01 : f32
    %104 = vector.broadcast %cst_43 : f32 to vector<1x32xf32>
    %105 = arith.mulf %104, %103 : vector<1x32xf32>
    %106 = math.tanh %105 : vector<1x32xf32>
    %cst_44 = arith.constant 1.000000e+00 : f32
    %107 = vector.broadcast %cst_44 : f32 to vector<1x32xf32>
    %108 = arith.addf %106, %107 : vector<1x32xf32>
    %cst_45 = arith.constant 5.000000e-01 : f32
    %109 = vector.broadcast %cst_45 : f32 to vector<1x32xf32>
    %110 = arith.mulf %109, %108 : vector<1x32xf32>
    %111 = vector.extract_strided_slice %92 {offsets = [0, 256], sizes = [1, 32], strides = [1, 1]} : vector<1x384xf32> to vector<1x32xf32>
    %112 = arith.addf %111, %19 : vector<1x32xf32>
    %113 = arith.mulf %101, %112 : vector<1x32xf32>
    %114 = arith.addf %91, %113 : vector<1x32xf32>
    %115 = math.tanh %114 : vector<1x32xf32>
    %cst_46 = arith.constant 1.000000e+00 : f32
    %116 = vector.broadcast %cst_46 : f32 to vector<1x32xf32>
    %117 = arith.subf %116, %110 : vector<1x32xf32>
    %118 = arith.mulf %117, %115 : vector<1x32xf32>
    %119 = arith.mulf %110, %54 : vector<1x32xf32>
    %120 = arith.addf %118, %119 : vector<1x32xf32>
    %121 = vector.extract_strided_slice %14 {offsets = [6, 0], sizes = [1, 32], strides = [1, 1]} : vector<8x32xf32> to vector<1x32xf32>
    %122 = vector.extract_strided_slice %15 {offsets = [6, 0], sizes = [1, 32], strides = [1, 1]} : vector<8x32xf32> to vector<1x32xf32>
    %123 = vector.extract_strided_slice %16 {offsets = [6, 0], sizes = [1, 32], strides = [1, 1]} : vector<8x32xf32> to vector<1x32xf32>
    %cst_47 = arith.constant dense<0.000000e+00> : vector<1x384xf32>
    %124 = tpu.matmul %86, %18, %cst_47 {dimension_numbers = #tpu.dot_dimension_numbers<[1], [0], [0], [1], [0, 0, 1, 1], [], []>} : vector<1x32xf32>, vector<32x384xf32>, vector<1x384xf32> -> vector<1x384xf32>
    %125 = vector.extract_strided_slice %124 {offsets = [0, 0], sizes = [1, 32], strides = [1, 1]} : vector<1x384xf32> to vector<1x32xf32>
    %126 = arith.addf %121, %125 : vector<1x32xf32>
    %cst_48 = arith.constant 5.000000e-01 : f32
    %127 = vector.broadcast %cst_48 : f32 to vector<1x32xf32>
    %128 = arith.mulf %127, %126 : vector<1x32xf32>
    %129 = math.tanh %128 : vector<1x32xf32>
    %cst_49 = arith.constant 1.000000e+00 : f32
    %130 = vector.broadcast %cst_49 : f32 to vector<1x32xf32>
    %131 = arith.addf %129, %130 : vector<1x32xf32>
    %cst_50 = arith.constant 5.000000e-01 : f32
    %132 = vector.broadcast %cst_50 : f32 to vector<1x32xf32>
    %133 = arith.mulf %132, %131 : vector<1x32xf32>
    %134 = vector.extract_strided_slice %124 {offsets = [0, 128], sizes = [1, 32], strides = [1, 1]} : vector<1x384xf32> to vector<1x32xf32>
    %135 = arith.addf %122, %134 : vector<1x32xf32>
    %cst_51 = arith.constant 5.000000e-01 : f32
    %136 = vector.broadcast %cst_51 : f32 to vector<1x32xf32>
    %137 = arith.mulf %136, %135 : vector<1x32xf32>
    %138 = math.tanh %137 : vector<1x32xf32>
    %cst_52 = arith.constant 1.000000e+00 : f32
    %139 = vector.broadcast %cst_52 : f32 to vector<1x32xf32>
    %140 = arith.addf %138, %139 : vector<1x32xf32>
    %cst_53 = arith.constant 5.000000e-01 : f32
    %141 = vector.broadcast %cst_53 : f32 to vector<1x32xf32>
    %142 = arith.mulf %141, %140 : vector<1x32xf32>
    %143 = vector.extract_strided_slice %124 {offsets = [0, 256], sizes = [1, 32], strides = [1, 1]} : vector<1x384xf32> to vector<1x32xf32>
    %144 = arith.addf %143, %20 : vector<1x32xf32>
    %145 = arith.mulf %133, %144 : vector<1x32xf32>
    %146 = arith.addf %123, %145 : vector<1x32xf32>
    %147 = math.tanh %146 : vector<1x32xf32>
    %cst_54 = arith.constant 1.000000e+00 : f32
    %148 = vector.broadcast %cst_54 : f32 to vector<1x32xf32>
    %149 = arith.subf %148, %142 : vector<1x32xf32>
    %150 = arith.mulf %149, %147 : vector<1x32xf32>
    %151 = arith.mulf %142, %86 : vector<1x32xf32>
    %152 = arith.addf %150, %151 : vector<1x32xf32>
    %c1 = arith.constant 1 : index
    %c0_55 = arith.constant 0 : index
    %153 = vector.load %arg13[%c1, %c0_55] : memref<8x32xf32, #tpu.memory_space<vmem>>, vector<1x32xf32>
    tpu.vector_store %arg13[%c1, %c0_55], %120 {strides = array<i32>} : memref<8x32xf32, #tpu.memory_space<vmem>>, vector<1x32xf32>,
    %c6 = arith.constant 6 : index
    %c0_56 = arith.constant 0 : index
    %154 = vector.load %arg14[%c6, %c0_56] : memref<8x32xf32, #tpu.memory_space<vmem>>, vector<1x32xf32>
    tpu.vector_store %arg14[%c6, %c0_56], %152 {strides = array<i32>} : memref<8x32xf32, #tpu.memory_space<vmem>>, vector<1x32xf32>,
    %155 = vector.extract_strided_slice %11 {offsets = [2, 0], sizes = [1, 32], strides = [1, 1]} : vector<8x32xf32> to vector<1x32xf32>
    %156 = vector.extract_strided_slice %12 {offsets = [2, 0], sizes = [1, 32], strides = [1, 1]} : vector<8x32xf32> to vector<1x32xf32>
    %157 = vector.extract_strided_slice %13 {offsets = [2, 0], sizes = [1, 32], strides = [1, 1]} : vector<8x32xf32> to vector<1x32xf32>
    %cst_57 = arith.constant dense<0.000000e+00> : vector<1x384xf32>
    %158 = tpu.matmul %120, %17, %cst_57 {dimension_numbers = #tpu.dot_dimension_numbers<[1], [0], [0], [1], [0, 0, 1, 1], [], []>} : vector<1x32xf32>, vector<32x384xf32>, vector<1x384xf32> -> vector<1x384xf32>
    %159 = vector.extract_strided_slice %158 {offsets = [0, 0], sizes = [1, 32], strides = [1, 1]} : vector<1x384xf32> to vector<1x32xf32>
    %160 = arith.addf %155, %159 : vector<1x32xf32>
    %cst_58 = arith.constant 5.000000e-01 : f32
    %161 = vector.broadcast %cst_58 : f32 to vector<1x32xf32>
    %162 = arith.mulf %161, %160 : vector<1x32xf32>
    %163 = math.tanh %162 : vector<1x32xf32>
    %cst_59 = arith.constant 1.000000e+00 : f32
    %164 = vector.broadcast %cst_59 : f32 to vector<1x32xf32>
    %165 = arith.addf %163, %164 : vector<1x32xf32>
    %cst_60 = arith.constant 5.000000e-01 : f32
    %166 = vector.broadcast %cst_60 : f32 to vector<1x32xf32>
    %167 = arith.mulf %166, %165 : vector<1x32xf32>
    %168 = vector.extract_strided_slice %158 {offsets = [0, 128], sizes = [1, 32], strides = [1, 1]} : vector<1x384xf32> to vector<1x32xf32>
    %169 = arith.addf %156, %168 : vector<1x32xf32>
    %cst_61 = arith.constant 5.000000e-01 : f32
    %170 = vector.broadcast %cst_61 : f32 to vector<1x32xf32>
    %171 = arith.mulf %170, %169 : vector<1x32xf32>
    %172 = math.tanh %171 : vector<1x32xf32>
    %cst_62 = arith.constant 1.000000e+00 : f32
    %173 = vector.broadcast %cst_62 : f32 to vector<1x32xf32>
    %174 = arith.addf %172, %173 : vector<1x32xf32>
    %cst_63 = arith.constant 5.000000e-01 : f32
    %175 = vector.broadcast %cst_63 : f32 to vector<1x32xf32>
    %176 = arith.mulf %175, %174 : vector<1x32xf32>
    %177 = vector.extract_strided_slice %158 {offsets = [0, 256], sizes = [1, 32], strides = [1, 1]} : vector<1x384xf32> to vector<1x32xf32>
    %178 = arith.addf %177, %19 : vector<1x32xf32>
    %179 = arith.mulf %167, %178 : vector<1x32xf32>
    %180 = arith.addf %157, %179 : vector<1x32xf32>
    %181 = math.tanh %180 : vector<1x32xf32>
    %cst_64 = arith.constant 1.000000e+00 : f32
    %182 = vector.broadcast %cst_64 : f32 to vector<1x32xf32>
    %183 = arith.subf %182, %176 : vector<1x32xf32>
    %184 = arith.mulf %183, %181 : vector<1x32xf32>
    %185 = arith.mulf %176, %120 : vector<1x32xf32>
    %186 = arith.addf %184, %185 : vector<1x32xf32>
    %187 = vector.extract_strided_slice %14 {offsets = [5, 0], sizes = [1, 32], strides = [1, 1]} : vector<8x32xf32> to vector<1x32xf32>
    %188 = vector.extract_strided_slice %15 {offsets = [5, 0], sizes = [1, 32], strides = [1, 1]} : vector<8x32xf32> to vector<1x32xf32>
    %189 = vector.extract_strided_slice %16 {offsets = [5, 0], sizes = [1, 32], strides = [1, 1]} : vector<8x32xf32> to vector<1x32xf32>
    %cst_65 = arith.constant dense<0.000000e+00> : vector<1x384xf32>
    %190 = tpu.matmul %152, %18, %cst_65 {dimension_numbers = #tpu.dot_dimension_numbers<[1], [0], [0], [1], [0, 0, 1, 1], [], []>} : vector<1x32xf32>, vector<32x384xf32>, vector<1x384xf32> -> vector<1x384xf32>
    %191 = vector.extract_strided_slice %190 {offsets = [0, 0], sizes = [1, 32], strides = [1, 1]} : vector<1x384xf32> to vector<1x32xf32>
    %192 = arith.addf %187, %191 : vector<1x32xf32>
    %cst_66 = arith.constant 5.000000e-01 : f32
    %193 = vector.broadcast %cst_66 : f32 to vector<1x32xf32>
    %194 = arith.mulf %193, %192 : vector<1x32xf32>
    %195 = math.tanh %194 : vector<1x32xf32>
    %cst_67 = arith.constant 1.000000e+00 : f32
    %196 = vector.broadcast %cst_67 : f32 to vector<1x32xf32>
    %197 = arith.addf %195, %196 : vector<1x32xf32>
    %cst_68 = arith.constant 5.000000e-01 : f32
    %198 = vector.broadcast %cst_68 : f32 to vector<1x32xf32>
    %199 = arith.mulf %198, %197 : vector<1x32xf32>
    %200 = vector.extract_strided_slice %190 {offsets = [0, 128], sizes = [1, 32], strides = [1, 1]} : vector<1x384xf32> to vector<1x32xf32>
    %201 = arith.addf %188, %200 : vector<1x32xf32>
    %cst_69 = arith.constant 5.000000e-01 : f32
    %202 = vector.broadcast %cst_69 : f32 to vector<1x32xf32>
    %203 = arith.mulf %202, %201 : vector<1x32xf32>
    %204 = math.tanh %203 : vector<1x32xf32>
    %cst_70 = arith.constant 1.000000e+00 : f32
    %205 = vector.broadcast %cst_70 : f32 to vector<1x32xf32>
    %206 = arith.addf %204, %205 : vector<1x32xf32>
    %cst_71 = arith.constant 5.000000e-01 : f32
    %207 = vector.broadcast %cst_71 : f32 to vector<1x32xf32>
    %208 = arith.mulf %207, %206 : vector<1x32xf32>
    %209 = vector.extract_strided_slice %190 {offsets = [0, 256], sizes = [1, 32], strides = [1, 1]} : vector<1x384xf32> to vector<1x32xf32>
    %210 = arith.addf %209, %20 : vector<1x32xf32>
    %211 = arith.mulf %199, %210 : vector<1x32xf32>
    %212 = arith.addf %189, %211 : vector<1x32xf32>
    %213 = math.tanh %212 : vector<1x32xf32>
    %cst_72 = arith.constant 1.000000e+00 : f32
    %214 = vector.broadcast %cst_72 : f32 to vector<1x32xf32>
    %215 = arith.subf %214, %208 : vector<1x32xf32>
    %216 = arith.mulf %215, %213 : vector<1x32xf32>
    %217 = arith.mulf %208, %152 : vector<1x32xf32>
    %218 = arith.addf %216, %217 : vector<1x32xf32>
    %c2 = arith.constant 2 : index
    %c0_73 = arith.constant 0 : index
    %219 = vector.load %arg13[%c2, %c0_73] : memref<8x32xf32, #tpu.memory_space<vmem>>, vector<1x32xf32>
    tpu.vector_store %arg13[%c2, %c0_73], %186 {strides = array<i32>} : memref<8x32xf32, #tpu.memory_space<vmem>>, vector<1x32xf32>,
    %c5 = arith.constant 5 : index
    %c0_74 = arith.constant 0 : index
    %220 = vector.load %arg14[%c5, %c0_74] : memref<8x32xf32, #tpu.memory_space<vmem>>, vector<1x32xf32>
    tpu.vector_store %arg14[%c5, %c0_74], %218 {strides = array<i32>} : memref<8x32xf32, #tpu.memory_space<vmem>>, vector<1x32xf32>,
    %221 = vector.extract_strided_slice %11 {offsets = [3, 0], sizes = [1, 32], strides = [1, 1]} : vector<8x32xf32> to vector<1x32xf32>
    %222 = vector.extract_strided_slice %12 {offsets = [3, 0], sizes = [1, 32], strides = [1, 1]} : vector<8x32xf32> to vector<1x32xf32>
    %223 = vector.extract_strided_slice %13 {offsets = [3, 0], sizes = [1, 32], strides = [1, 1]} : vector<8x32xf32> to vector<1x32xf32>
    %cst_75 = arith.constant dense<0.000000e+00> : vector<1x384xf32>
    %224 = tpu.matmul %186, %17, %cst_75 {dimension_numbers = #tpu.dot_dimension_numbers<[1], [0], [0], [1], [0, 0, 1, 1], [], []>} : vector<1x32xf32>, vector<32x384xf32>, vector<1x384xf32> -> vector<1x384xf32>
    %225 = vector.extract_strided_slice %224 {offsets = [0, 0], sizes = [1, 32], strides = [1, 1]} : vector<1x384xf32> to vector<1x32xf32>
    %226 = arith.addf %221, %225 : vector<1x32xf32>
    %cst_76 = arith.constant 5.000000e-01 : f32
    %227 = vector.broadcast %cst_76 : f32 to vector<1x32xf32>
    %228 = arith.mulf %227, %226 : vector<1x32xf32>
    %229 = math.tanh %228 : vector<1x32xf32>
    %cst_77 = arith.constant 1.000000e+00 : f32
    %230 = vector.broadcast %cst_77 : f32 to vector<1x32xf32>
    %231 = arith.addf %229, %230 : vector<1x32xf32>
    %cst_78 = arith.constant 5.000000e-01 : f32
    %232 = vector.broadcast %cst_78 : f32 to vector<1x32xf32>
    %233 = arith.mulf %232, %231 : vector<1x32xf32>
    %234 = vector.extract_strided_slice %224 {offsets = [0, 128], sizes = [1, 32], strides = [1, 1]} : vector<1x384xf32> to vector<1x32xf32>
    %235 = arith.addf %222, %234 : vector<1x32xf32>
    %cst_79 = arith.constant 5.000000e-01 : f32
    %236 = vector.broadcast %cst_79 : f32 to vector<1x32xf32>
    %237 = arith.mulf %236, %235 : vector<1x32xf32>
    %238 = math.tanh %237 : vector<1x32xf32>
    %cst_80 = arith.constant 1.000000e+00 : f32
    %239 = vector.broadcast %cst_80 : f32 to vector<1x32xf32>
    %240 = arith.addf %238, %239 : vector<1x32xf32>
    %cst_81 = arith.constant 5.000000e-01 : f32
    %241 = vector.broadcast %cst_81 : f32 to vector<1x32xf32>
    %242 = arith.mulf %241, %240 : vector<1x32xf32>
    %243 = vector.extract_strided_slice %224 {offsets = [0, 256], sizes = [1, 32], strides = [1, 1]} : vector<1x384xf32> to vector<1x32xf32>
    %244 = arith.addf %243, %19 : vector<1x32xf32>
    %245 = arith.mulf %233, %244 : vector<1x32xf32>
    %246 = arith.addf %223, %245 : vector<1x32xf32>
    %247 = math.tanh %246 : vector<1x32xf32>
    %cst_82 = arith.constant 1.000000e+00 : f32
    %248 = vector.broadcast %cst_82 : f32 to vector<1x32xf32>
    %249 = arith.subf %248, %242 : vector<1x32xf32>
    %250 = arith.mulf %249, %247 : vector<1x32xf32>
    %251 = arith.mulf %242, %186 : vector<1x32xf32>
    %252 = arith.addf %250, %251 : vector<1x32xf32>
    %253 = vector.extract_strided_slice %14 {offsets = [4, 0], sizes = [1, 32], strides = [1, 1]} : vector<8x32xf32> to vector<1x32xf32>
    %254 = vector.extract_strided_slice %15 {offsets = [4, 0], sizes = [1, 32], strides = [1, 1]} : vector<8x32xf32> to vector<1x32xf32>
    %255 = vector.extract_strided_slice %16 {offsets = [4, 0], sizes = [1, 32], strides = [1, 1]} : vector<8x32xf32> to vector<1x32xf32>
    %cst_83 = arith.constant dense<0.000000e+00> : vector<1x384xf32>
    %256 = tpu.matmul %218, %18, %cst_83 {dimension_numbers = #tpu.dot_dimension_numbers<[1], [0], [0], [1], [0, 0, 1, 1], [], []>} : vector<1x32xf32>, vector<32x384xf32>, vector<1x384xf32> -> vector<1x384xf32>
    %257 = vector.extract_strided_slice %256 {offsets = [0, 0], sizes = [1, 32], strides = [1, 1]} : vector<1x384xf32> to vector<1x32xf32>
    %258 = arith.addf %253, %257 : vector<1x32xf32>
    %cst_84 = arith.constant 5.000000e-01 : f32
    %259 = vector.broadcast %cst_84 : f32 to vector<1x32xf32>
    %260 = arith.mulf %259, %258 : vector<1x32xf32>
    %261 = math.tanh %260 : vector<1x32xf32>
    %cst_85 = arith.constant 1.000000e+00 : f32
    %262 = vector.broadcast %cst_85 : f32 to vector<1x32xf32>
    %263 = arith.addf %261, %262 : vector<1x32xf32>
    %cst_86 = arith.constant 5.000000e-01 : f32
    %264 = vector.broadcast %cst_86 : f32 to vector<1x32xf32>
    %265 = arith.mulf %264, %263 : vector<1x32xf32>
    %266 = vector.extract_strided_slice %256 {offsets = [0, 128], sizes = [1, 32], strides = [1, 1]} : vector<1x384xf32> to vector<1x32xf32>
    %267 = arith.addf %254, %266 : vector<1x32xf32>
    %cst_87 = arith.constant 5.000000e-01 : f32
    %268 = vector.broadcast %cst_87 : f32 to vector<1x32xf32>
    %269 = arith.mulf %268, %267 : vector<1x32xf32>
    %270 = math.tanh %269 : vector<1x32xf32>
    %cst_88 = arith.constant 1.000000e+00 : f32
    %271 = vector.broadcast %cst_88 : f32 to vector<1x32xf32>
    %272 = arith.addf %270, %271 : vector<1x32xf32>
    %cst_89 = arith.constant 5.000000e-01 : f32
    %273 = vector.broadcast %cst_89 : f32 to vector<1x32xf32>
    %274 = arith.mulf %273, %272 : vector<1x32xf32>
    %275 = vector.extract_strided_slice %256 {offsets = [0, 256], sizes = [1, 32], strides = [1, 1]} : vector<1x384xf32> to vector<1x32xf32>
    %276 = arith.addf %275, %20 : vector<1x32xf32>
    %277 = arith.mulf %265, %276 : vector<1x32xf32>
    %278 = arith.addf %255, %277 : vector<1x32xf32>
    %279 = math.tanh %278 : vector<1x32xf32>
    %cst_90 = arith.constant 1.000000e+00 : f32
    %280 = vector.broadcast %cst_90 : f32 to vector<1x32xf32>
    %281 = arith.subf %280, %274 : vector<1x32xf32>
    %282 = arith.mulf %281, %279 : vector<1x32xf32>
    %283 = arith.mulf %274, %218 : vector<1x32xf32>
    %284 = arith.addf %282, %283 : vector<1x32xf32>
    %c3 = arith.constant 3 : index
    %c0_91 = arith.constant 0 : index
    %285 = vector.load %arg13[%c3, %c0_91] : memref<8x32xf32, #tpu.memory_space<vmem>>, vector<1x32xf32>
    tpu.vector_store %arg13[%c3, %c0_91], %252 {strides = array<i32>} : memref<8x32xf32, #tpu.memory_space<vmem>>, vector<1x32xf32>,
    %c4 = arith.constant 4 : index
    %c0_92 = arith.constant 0 : index
    %286 = vector.load %arg14[%c4, %c0_92] : memref<8x32xf32, #tpu.memory_space<vmem>>, vector<1x32xf32>
    tpu.vector_store %arg14[%c4, %c0_92], %284 {strides = array<i32>} : memref<8x32xf32, #tpu.memory_space<vmem>>, vector<1x32xf32>,
    %287 = vector.extract_strided_slice %11 {offsets = [4, 0], sizes = [1, 32], strides = [1, 1]} : vector<8x32xf32> to vector<1x32xf32>
    %288 = vector.extract_strided_slice %12 {offsets = [4, 0], sizes = [1, 32], strides = [1, 1]} : vector<8x32xf32> to vector<1x32xf32>
    %289 = vector.extract_strided_slice %13 {offsets = [4, 0], sizes = [1, 32], strides = [1, 1]} : vector<8x32xf32> to vector<1x32xf32>
    %cst_93 = arith.constant dense<0.000000e+00> : vector<1x384xf32>
    %290 = tpu.matmul %252, %17, %cst_93 {dimension_numbers = #tpu.dot_dimension_numbers<[1], [0], [0], [1], [0, 0, 1, 1], [], []>} : vector<1x32xf32>, vector<32x384xf32>, vector<1x384xf32> -> vector<1x384xf32>
    %291 = vector.extract_strided_slice %290 {offsets = [0, 0], sizes = [1, 32], strides = [1, 1]} : vector<1x384xf32> to vector<1x32xf32>
    %292 = arith.addf %287, %291 : vector<1x32xf32>
    %cst_94 = arith.constant 5.000000e-01 : f32
    %293 = vector.broadcast %cst_94 : f32 to vector<1x32xf32>
    %294 = arith.mulf %293, %292 : vector<1x32xf32>
    %295 = math.tanh %294 : vector<1x32xf32>
    %cst_95 = arith.constant 1.000000e+00 : f32
    %296 = vector.broadcast %cst_95 : f32 to vector<1x32xf32>
    %297 = arith.addf %295, %296 : vector<1x32xf32>
    %cst_96 = arith.constant 5.000000e-01 : f32
    %298 = vector.broadcast %cst_96 : f32 to vector<1x32xf32>
    %299 = arith.mulf %298, %297 : vector<1x32xf32>
    %300 = vector.extract_strided_slice %290 {offsets = [0, 128], sizes = [1, 32], strides = [1, 1]} : vector<1x384xf32> to vector<1x32xf32>
    %301 = arith.addf %288, %300 : vector<1x32xf32>
    %cst_97 = arith.constant 5.000000e-01 : f32
    %302 = vector.broadcast %cst_97 : f32 to vector<1x32xf32>
    %303 = arith.mulf %302, %301 : vector<1x32xf32>
    %304 = math.tanh %303 : vector<1x32xf32>
    %cst_98 = arith.constant 1.000000e+00 : f32
    %305 = vector.broadcast %cst_98 : f32 to vector<1x32xf32>
    %306 = arith.addf %304, %305 : vector<1x32xf32>
    %cst_99 = arith.constant 5.000000e-01 : f32
    %307 = vector.broadcast %cst_99 : f32 to vector<1x32xf32>
    %308 = arith.mulf %307, %306 : vector<1x32xf32>
    %309 = vector.extract_strided_slice %290 {offsets = [0, 256], sizes = [1, 32], strides = [1, 1]} : vector<1x384xf32> to vector<1x32xf32>
    %310 = arith.addf %309, %19 : vector<1x32xf32>
    %311 = arith.mulf %299, %310 : vector<1x32xf32>
    %312 = arith.addf %289, %311 : vector<1x32xf32>
    %313 = math.tanh %312 : vector<1x32xf32>
    %cst_100 = arith.constant 1.000000e+00 : f32
    %314 = vector.broadcast %cst_100 : f32 to vector<1x32xf32>
    %315 = arith.subf %314, %308 : vector<1x32xf32>
    %316 = arith.mulf %315, %313 : vector<1x32xf32>
    %317 = arith.mulf %308, %252 : vector<1x32xf32>
    %318 = arith.addf %316, %317 : vector<1x32xf32>
    %319 = vector.extract_strided_slice %14 {offsets = [3, 0], sizes = [1, 32], strides = [1, 1]} : vector<8x32xf32> to vector<1x32xf32>
    %320 = vector.extract_strided_slice %15 {offsets = [3, 0], sizes = [1, 32], strides = [1, 1]} : vector<8x32xf32> to vector<1x32xf32>
    %321 = vector.extract_strided_slice %16 {offsets = [3, 0], sizes = [1, 32], strides = [1, 1]} : vector<8x32xf32> to vector<1x32xf32>
    %cst_101 = arith.constant dense<0.000000e+00> : vector<1x384xf32>
    %322 = tpu.matmul %284, %18, %cst_101 {dimension_numbers = #tpu.dot_dimension_numbers<[1], [0], [0], [1], [0, 0, 1, 1], [], []>} : vector<1x32xf32>, vector<32x384xf32>, vector<1x384xf32> -> vector<1x384xf32>
    %323 = vector.extract_strided_slice %322 {offsets = [0, 0], sizes = [1, 32], strides = [1, 1]} : vector<1x384xf32> to vector<1x32xf32>
    %324 = arith.addf %319, %323 : vector<1x32xf32>
    %cst_102 = arith.constant 5.000000e-01 : f32
    %325 = vector.broadcast %cst_102 : f32 to vector<1x32xf32>
    %326 = arith.mulf %325, %324 : vector<1x32xf32>
    %327 = math.tanh %326 : vector<1x32xf32>
    %cst_103 = arith.constant 1.000000e+00 : f32
    %328 = vector.broadcast %cst_103 : f32 to vector<1x32xf32>
    %329 = arith.addf %327, %328 : vector<1x32xf32>
    %cst_104 = arith.constant 5.000000e-01 : f32
    %330 = vector.broadcast %cst_104 : f32 to vector<1x32xf32>
    %331 = arith.mulf %330, %329 : vector<1x32xf32>
    %332 = vector.extract_strided_slice %322 {offsets = [0, 128], sizes = [1, 32], strides = [1, 1]} : vector<1x384xf32> to vector<1x32xf32>
    %333 = arith.addf %320, %332 : vector<1x32xf32>
    %cst_105 = arith.constant 5.000000e-01 : f32
    %334 = vector.broadcast %cst_105 : f32 to vector<1x32xf32>
    %335 = arith.mulf %334, %333 : vector<1x32xf32>
    %336 = math.tanh %335 : vector<1x32xf32>
    %cst_106 = arith.constant 1.000000e+00 : f32
    %337 = vector.broadcast %cst_106 : f32 to vector<1x32xf32>
    %338 = arith.addf %336, %337 : vector<1x32xf32>
    %cst_107 = arith.constant 5.000000e-01 : f32
    %339 = vector.broadcast %cst_107 : f32 to vector<1x32xf32>
    %340 = arith.mulf %339, %338 : vector<1x32xf32>
    %341 = vector.extract_strided_slice %322 {offsets = [0, 256], sizes = [1, 32], strides = [1, 1]} : vector<1x384xf32> to vector<1x32xf32>
    %342 = arith.addf %341, %20 : vector<1x32xf32>
    %343 = arith.mulf %331, %342 : vector<1x32xf32>
    %344 = arith.addf %321, %343 : vector<1x32xf32>
    %345 = math.tanh %344 : vector<1x32xf32>
    %cst_108 = arith.constant 1.000000e+00 : f32
    %346 = vector.broadcast %cst_108 : f32 to vector<1x32xf32>
    %347 = arith.subf %346, %340 : vector<1x32xf32>
    %348 = arith.mulf %347, %345 : vector<1x32xf32>
    %349 = arith.mulf %340, %284 : vector<1x32xf32>
    %350 = arith.addf %348, %349 : vector<1x32xf32>
    %c4_109 = arith.constant 4 : index
    %c0_110 = arith.constant 0 : index
    %351 = vector.load %arg13[%c4_109, %c0_110] : memref<8x32xf32, #tpu.memory_space<vmem>>, vector<1x32xf32>
    tpu.vector_store %arg13[%c4_109, %c0_110], %318 {strides = array<i32>} : memref<8x32xf32, #tpu.memory_space<vmem>>, vector<1x32xf32>,
    %c3_111 = arith.constant 3 : index
    %c0_112 = arith.constant 0 : index
    %352 = vector.load %arg14[%c3_111, %c0_112] : memref<8x32xf32, #tpu.memory_space<vmem>>, vector<1x32xf32>
    tpu.vector_store %arg14[%c3_111, %c0_112], %350 {strides = array<i32>} : memref<8x32xf32, #tpu.memory_space<vmem>>, vector<1x32xf32>,
    %353 = vector.extract_strided_slice %11 {offsets = [5, 0], sizes = [1, 32], strides = [1, 1]} : vector<8x32xf32> to vector<1x32xf32>
    %354 = vector.extract_strided_slice %12 {offsets = [5, 0], sizes = [1, 32], strides = [1, 1]} : vector<8x32xf32> to vector<1x32xf32>
    %355 = vector.extract_strided_slice %13 {offsets = [5, 0], sizes = [1, 32], strides = [1, 1]} : vector<8x32xf32> to vector<1x32xf32>
    %cst_113 = arith.constant dense<0.000000e+00> : vector<1x384xf32>
    %356 = tpu.matmul %318, %17, %cst_113 {dimension_numbers = #tpu.dot_dimension_numbers<[1], [0], [0], [1], [0, 0, 1, 1], [], []>} : vector<1x32xf32>, vector<32x384xf32>, vector<1x384xf32> -> vector<1x384xf32>
    %357 = vector.extract_strided_slice %356 {offsets = [0, 0], sizes = [1, 32], strides = [1, 1]} : vector<1x384xf32> to vector<1x32xf32>
    %358 = arith.addf %353, %357 : vector<1x32xf32>
    %cst_114 = arith.constant 5.000000e-01 : f32
    %359 = vector.broadcast %cst_114 : f32 to vector<1x32xf32>
    %360 = arith.mulf %359, %358 : vector<1x32xf32>
    %361 = math.tanh %360 : vector<1x32xf32>
    %cst_115 = arith.constant 1.000000e+00 : f32
    %362 = vector.broadcast %cst_115 : f32 to vector<1x32xf32>
    %363 = arith.addf %361, %362 : vector<1x32xf32>
    %cst_116 = arith.constant 5.000000e-01 : f32
    %364 = vector.broadcast %cst_116 : f32 to vector<1x32xf32>
    %365 = arith.mulf %364, %363 : vector<1x32xf32>
    %366 = vector.extract_strided_slice %356 {offsets = [0, 128], sizes = [1, 32], strides = [1, 1]} : vector<1x384xf32> to vector<1x32xf32>
    %367 = arith.addf %354, %366 : vector<1x32xf32>
    %cst_117 = arith.constant 5.000000e-01 : f32
    %368 = vector.broadcast %cst_117 : f32 to vector<1x32xf32>
    %369 = arith.mulf %368, %367 : vector<1x32xf32>
    %370 = math.tanh %369 : vector<1x32xf32>
    %cst_118 = arith.constant 1.000000e+00 : f32
    %371 = vector.broadcast %cst_118 : f32 to vector<1x32xf32>
    %372 = arith.addf %370, %371 : vector<1x32xf32>
    %cst_119 = arith.constant 5.000000e-01 : f32
    %373 = vector.broadcast %cst_119 : f32 to vector<1x32xf32>
    %374 = arith.mulf %373, %372 : vector<1x32xf32>
    %375 = vector.extract_strided_slice %356 {offsets = [0, 256], sizes = [1, 32], strides = [1, 1]} : vector<1x384xf32> to vector<1x32xf32>
    %376 = arith.addf %375, %19 : vector<1x32xf32>
    %377 = arith.mulf %365, %376 : vector<1x32xf32>
    %378 = arith.addf %355, %377 : vector<1x32xf32>
    %379 = math.tanh %378 : vector<1x32xf32>
    %cst_120 = arith.constant 1.000000e+00 : f32
    %380 = vector.broadcast %cst_120 : f32 to vector<1x32xf32>
    %381 = arith.subf %380, %374 : vector<1x32xf32>
    %382 = arith.mulf %381, %379 : vector<1x32xf32>
    %383 = arith.mulf %374, %318 : vector<1x32xf32>
    %384 = arith.addf %382, %383 : vector<1x32xf32>
    %385 = vector.extract_strided_slice %14 {offsets = [2, 0], sizes = [1, 32], strides = [1, 1]} : vector<8x32xf32> to vector<1x32xf32>
    %386 = vector.extract_strided_slice %15 {offsets = [2, 0], sizes = [1, 32], strides = [1, 1]} : vector<8x32xf32> to vector<1x32xf32>
    %387 = vector.extract_strided_slice %16 {offsets = [2, 0], sizes = [1, 32], strides = [1, 1]} : vector<8x32xf32> to vector<1x32xf32>
    %cst_121 = arith.constant dense<0.000000e+00> : vector<1x384xf32>
    %388 = tpu.matmul %350, %18, %cst_121 {dimension_numbers = #tpu.dot_dimension_numbers<[1], [0], [0], [1], [0, 0, 1, 1], [], []>} : vector<1x32xf32>, vector<32x384xf32>, vector<1x384xf32> -> vector<1x384xf32>
    %389 = vector.extract_strided_slice %388 {offsets = [0, 0], sizes = [1, 32], strides = [1, 1]} : vector<1x384xf32> to vector<1x32xf32>
    %390 = arith.addf %385, %389 : vector<1x32xf32>
    %cst_122 = arith.constant 5.000000e-01 : f32
    %391 = vector.broadcast %cst_122 : f32 to vector<1x32xf32>
    %392 = arith.mulf %391, %390 : vector<1x32xf32>
    %393 = math.tanh %392 : vector<1x32xf32>
    %cst_123 = arith.constant 1.000000e+00 : f32
    %394 = vector.broadcast %cst_123 : f32 to vector<1x32xf32>
    %395 = arith.addf %393, %394 : vector<1x32xf32>
    %cst_124 = arith.constant 5.000000e-01 : f32
    %396 = vector.broadcast %cst_124 : f32 to vector<1x32xf32>
    %397 = arith.mulf %396, %395 : vector<1x32xf32>
    %398 = vector.extract_strided_slice %388 {offsets = [0, 128], sizes = [1, 32], strides = [1, 1]} : vector<1x384xf32> to vector<1x32xf32>
    %399 = arith.addf %386, %398 : vector<1x32xf32>
    %cst_125 = arith.constant 5.000000e-01 : f32
    %400 = vector.broadcast %cst_125 : f32 to vector<1x32xf32>
    %401 = arith.mulf %400, %399 : vector<1x32xf32>
    %402 = math.tanh %401 : vector<1x32xf32>
    %cst_126 = arith.constant 1.000000e+00 : f32
    %403 = vector.broadcast %cst_126 : f32 to vector<1x32xf32>
    %404 = arith.addf %402, %403 : vector<1x32xf32>
    %cst_127 = arith.constant 5.000000e-01 : f32
    %405 = vector.broadcast %cst_127 : f32 to vector<1x32xf32>
    %406 = arith.mulf %405, %404 : vector<1x32xf32>
    %407 = vector.extract_strided_slice %388 {offsets = [0, 256], sizes = [1, 32], strides = [1, 1]} : vector<1x384xf32> to vector<1x32xf32>
    %408 = arith.addf %407, %20 : vector<1x32xf32>
    %409 = arith.mulf %397, %408 : vector<1x32xf32>
    %410 = arith.addf %387, %409 : vector<1x32xf32>
    %411 = math.tanh %410 : vector<1x32xf32>
    %cst_128 = arith.constant 1.000000e+00 : f32
    %412 = vector.broadcast %cst_128 : f32 to vector<1x32xf32>
    %413 = arith.subf %412, %406 : vector<1x32xf32>
    %414 = arith.mulf %413, %411 : vector<1x32xf32>
    %415 = arith.mulf %406, %350 : vector<1x32xf32>
    %416 = arith.addf %414, %415 : vector<1x32xf32>
    %c5_129 = arith.constant 5 : index
    %c0_130 = arith.constant 0 : index
    %417 = vector.load %arg13[%c5_129, %c0_130] : memref<8x32xf32, #tpu.memory_space<vmem>>, vector<1x32xf32>
    tpu.vector_store %arg13[%c5_129, %c0_130], %384 {strides = array<i32>} : memref<8x32xf32, #tpu.memory_space<vmem>>, vector<1x32xf32>,
    %c2_131 = arith.constant 2 : index
    %c0_132 = arith.constant 0 : index
    %418 = vector.load %arg14[%c2_131, %c0_132] : memref<8x32xf32, #tpu.memory_space<vmem>>, vector<1x32xf32>
    tpu.vector_store %arg14[%c2_131, %c0_132], %416 {strides = array<i32>} : memref<8x32xf32, #tpu.memory_space<vmem>>, vector<1x32xf32>,
    %419 = vector.extract_strided_slice %11 {offsets = [6, 0], sizes = [1, 32], strides = [1, 1]} : vector<8x32xf32> to vector<1x32xf32>
    %420 = vector.extract_strided_slice %12 {offsets = [6, 0], sizes = [1, 32], strides = [1, 1]} : vector<8x32xf32> to vector<1x32xf32>
    %421 = vector.extract_strided_slice %13 {offsets = [6, 0], sizes = [1, 32], strides = [1, 1]} : vector<8x32xf32> to vector<1x32xf32>
    %cst_133 = arith.constant dense<0.000000e+00> : vector<1x384xf32>
    %422 = tpu.matmul %384, %17, %cst_133 {dimension_numbers = #tpu.dot_dimension_numbers<[1], [0], [0], [1], [0, 0, 1, 1], [], []>} : vector<1x32xf32>, vector<32x384xf32>, vector<1x384xf32> -> vector<1x384xf32>
    %423 = vector.extract_strided_slice %422 {offsets = [0, 0], sizes = [1, 32], strides = [1, 1]} : vector<1x384xf32> to vector<1x32xf32>
    %424 = arith.addf %419, %423 : vector<1x32xf32>
    %cst_134 = arith.constant 5.000000e-01 : f32
    %425 = vector.broadcast %cst_134 : f32 to vector<1x32xf32>
    %426 = arith.mulf %425, %424 : vector<1x32xf32>
    %427 = math.tanh %426 : vector<1x32xf32>
    %cst_135 = arith.constant 1.000000e+00 : f32
    %428 = vector.broadcast %cst_135 : f32 to vector<1x32xf32>
    %429 = arith.addf %427, %428 : vector<1x32xf32>
    %cst_136 = arith.constant 5.000000e-01 : f32
    %430 = vector.broadcast %cst_136 : f32 to vector<1x32xf32>
    %431 = arith.mulf %430, %429 : vector<1x32xf32>
    %432 = vector.extract_strided_slice %422 {offsets = [0, 128], sizes = [1, 32], strides = [1, 1]} : vector<1x384xf32> to vector<1x32xf32>
    %433 = arith.addf %420, %432 : vector<1x32xf32>
    %cst_137 = arith.constant 5.000000e-01 : f32
    %434 = vector.broadcast %cst_137 : f32 to vector<1x32xf32>
    %435 = arith.mulf %434, %433 : vector<1x32xf32>
    %436 = math.tanh %435 : vector<1x32xf32>
    %cst_138 = arith.constant 1.000000e+00 : f32
    %437 = vector.broadcast %cst_138 : f32 to vector<1x32xf32>
    %438 = arith.addf %436, %437 : vector<1x32xf32>
    %cst_139 = arith.constant 5.000000e-01 : f32
    %439 = vector.broadcast %cst_139 : f32 to vector<1x32xf32>
    %440 = arith.mulf %439, %438 : vector<1x32xf32>
    %441 = vector.extract_strided_slice %422 {offsets = [0, 256], sizes = [1, 32], strides = [1, 1]} : vector<1x384xf32> to vector<1x32xf32>
    %442 = arith.addf %441, %19 : vector<1x32xf32>
    %443 = arith.mulf %431, %442 : vector<1x32xf32>
    %444 = arith.addf %421, %443 : vector<1x32xf32>
    %445 = math.tanh %444 : vector<1x32xf32>
    %cst_140 = arith.constant 1.000000e+00 : f32
    %446 = vector.broadcast %cst_140 : f32 to vector<1x32xf32>
    %447 = arith.subf %446, %440 : vector<1x32xf32>
    %448 = arith.mulf %447, %445 : vector<1x32xf32>
    %449 = arith.mulf %440, %384 : vector<1x32xf32>
    %450 = arith.addf %448, %449 : vector<1x32xf32>
    %451 = vector.extract_strided_slice %14 {offsets = [1, 0], sizes = [1, 32], strides = [1, 1]} : vector<8x32xf32> to vector<1x32xf32>
    %452 = vector.extract_strided_slice %15 {offsets = [1, 0], sizes = [1, 32], strides = [1, 1]} : vector<8x32xf32> to vector<1x32xf32>
    %453 = vector.extract_strided_slice %16 {offsets = [1, 0], sizes = [1, 32], strides = [1, 1]} : vector<8x32xf32> to vector<1x32xf32>
    %cst_141 = arith.constant dense<0.000000e+00> : vector<1x384xf32>
    %454 = tpu.matmul %416, %18, %cst_141 {dimension_numbers = #tpu.dot_dimension_numbers<[1], [0], [0], [1], [0, 0, 1, 1], [], []>} : vector<1x32xf32>, vector<32x384xf32>, vector<1x384xf32> -> vector<1x384xf32>
    %455 = vector.extract_strided_slice %454 {offsets = [0, 0], sizes = [1, 32], strides = [1, 1]} : vector<1x384xf32> to vector<1x32xf32>
    %456 = arith.addf %451, %455 : vector<1x32xf32>
    %cst_142 = arith.constant 5.000000e-01 : f32
    %457 = vector.broadcast %cst_142 : f32 to vector<1x32xf32>
    %458 = arith.mulf %457, %456 : vector<1x32xf32>
    %459 = math.tanh %458 : vector<1x32xf32>
    %cst_143 = arith.constant 1.000000e+00 : f32
    %460 = vector.broadcast %cst_143 : f32 to vector<1x32xf32>
    %461 = arith.addf %459, %460 : vector<1x32xf32>
    %cst_144 = arith.constant 5.000000e-01 : f32
    %462 = vector.broadcast %cst_144 : f32 to vector<1x32xf32>
    %463 = arith.mulf %462, %461 : vector<1x32xf32>
    %464 = vector.extract_strided_slice %454 {offsets = [0, 128], sizes = [1, 32], strides = [1, 1]} : vector<1x384xf32> to vector<1x32xf32>
    %465 = arith.addf %452, %464 : vector<1x32xf32>
    %cst_145 = arith.constant 5.000000e-01 : f32
    %466 = vector.broadcast %cst_145 : f32 to vector<1x32xf32>
    %467 = arith.mulf %466, %465 : vector<1x32xf32>
    %468 = math.tanh %467 : vector<1x32xf32>
    %cst_146 = arith.constant 1.000000e+00 : f32
    %469 = vector.broadcast %cst_146 : f32 to vector<1x32xf32>
    %470 = arith.addf %468, %469 : vector<1x32xf32>
    %cst_147 = arith.constant 5.000000e-01 : f32
    %471 = vector.broadcast %cst_147 : f32 to vector<1x32xf32>
    %472 = arith.mulf %471, %470 : vector<1x32xf32>
    %473 = vector.extract_strided_slice %454 {offsets = [0, 256], sizes = [1, 32], strides = [1, 1]} : vector<1x384xf32> to vector<1x32xf32>
    %474 = arith.addf %473, %20 : vector<1x32xf32>
    %475 = arith.mulf %463, %474 : vector<1x32xf32>
    %476 = arith.addf %453, %475 : vector<1x32xf32>
    %477 = math.tanh %476 : vector<1x32xf32>
    %cst_148 = arith.constant 1.000000e+00 : f32
    %478 = vector.broadcast %cst_148 : f32 to vector<1x32xf32>
    %479 = arith.subf %478, %472 : vector<1x32xf32>
    %480 = arith.mulf %479, %477 : vector<1x32xf32>
    %481 = arith.mulf %472, %416 : vector<1x32xf32>
    %482 = arith.addf %480, %481 : vector<1x32xf32>
    %c6_149 = arith.constant 6 : index
    %c0_150 = arith.constant 0 : index
    %483 = vector.load %arg13[%c6_149, %c0_150] : memref<8x32xf32, #tpu.memory_space<vmem>>, vector<1x32xf32>
    tpu.vector_store %arg13[%c6_149, %c0_150], %450 {strides = array<i32>} : memref<8x32xf32, #tpu.memory_space<vmem>>, vector<1x32xf32>,
    %c1_151 = arith.constant 1 : index
    %c0_152 = arith.constant 0 : index
    %484 = vector.load %arg14[%c1_151, %c0_152] : memref<8x32xf32, #tpu.memory_space<vmem>>, vector<1x32xf32>
    tpu.vector_store %arg14[%c1_151, %c0_152], %482 {strides = array<i32>} : memref<8x32xf32, #tpu.memory_space<vmem>>, vector<1x32xf32>,
    %485 = vector.extract_strided_slice %11 {offsets = [7, 0], sizes = [1, 32], strides = [1, 1]} : vector<8x32xf32> to vector<1x32xf32>
    %486 = vector.extract_strided_slice %12 {offsets = [7, 0], sizes = [1, 32], strides = [1, 1]} : vector<8x32xf32> to vector<1x32xf32>
    %487 = vector.extract_strided_slice %13 {offsets = [7, 0], sizes = [1, 32], strides = [1, 1]} : vector<8x32xf32> to vector<1x32xf32>
    %cst_153 = arith.constant dense<0.000000e+00> : vector<1x384xf32>
    %488 = tpu.matmul %450, %17, %cst_153 {dimension_numbers = #tpu.dot_dimension_numbers<[1], [0], [0], [1], [0, 0, 1, 1], [], []>} : vector<1x32xf32>, vector<32x384xf32>, vector<1x384xf32> -> vector<1x384xf32>
    %489 = vector.extract_strided_slice %488 {offsets = [0, 0], sizes = [1, 32], strides = [1, 1]} : vector<1x384xf32> to vector<1x32xf32>
    %490 = arith.addf %485, %489 : vector<1x32xf32>
    %cst_154 = arith.constant 5.000000e-01 : f32
    %491 = vector.broadcast %cst_154 : f32 to vector<1x32xf32>
    %492 = arith.mulf %491, %490 : vector<1x32xf32>
    %493 = math.tanh %492 : vector<1x32xf32>
    %cst_155 = arith.constant 1.000000e+00 : f32
    %494 = vector.broadcast %cst_155 : f32 to vector<1x32xf32>
    %495 = arith.addf %493, %494 : vector<1x32xf32>
    %cst_156 = arith.constant 5.000000e-01 : f32
    %496 = vector.broadcast %cst_156 : f32 to vector<1x32xf32>
    %497 = arith.mulf %496, %495 : vector<1x32xf32>
    %498 = vector.extract_strided_slice %488 {offsets = [0, 128], sizes = [1, 32], strides = [1, 1]} : vector<1x384xf32> to vector<1x32xf32>
    %499 = arith.addf %486, %498 : vector<1x32xf32>
    %cst_157 = arith.constant 5.000000e-01 : f32
    %500 = vector.broadcast %cst_157 : f32 to vector<1x32xf32>
    %501 = arith.mulf %500, %499 : vector<1x32xf32>
    %502 = math.tanh %501 : vector<1x32xf32>
    %cst_158 = arith.constant 1.000000e+00 : f32
    %503 = vector.broadcast %cst_158 : f32 to vector<1x32xf32>
    %504 = arith.addf %502, %503 : vector<1x32xf32>
    %cst_159 = arith.constant 5.000000e-01 : f32
    %505 = vector.broadcast %cst_159 : f32 to vector<1x32xf32>
    %506 = arith.mulf %505, %504 : vector<1x32xf32>
    %507 = vector.extract_strided_slice %488 {offsets = [0, 256], sizes = [1, 32], strides = [1, 1]} : vector<1x384xf32> to vector<1x32xf32>
    %508 = arith.addf %507, %19 : vector<1x32xf32>
    %509 = arith.mulf %497, %508 : vector<1x32xf32>
    %510 = arith.addf %487, %509 : vector<1x32xf32>
    %511 = math.tanh %510 : vector<1x32xf32>
    %cst_160 = arith.constant 1.000000e+00 : f32
    %512 = vector.broadcast %cst_160 : f32 to vector<1x32xf32>
    %513 = arith.subf %512, %506 : vector<1x32xf32>
    %514 = arith.mulf %513, %511 : vector<1x32xf32>
    %515 = arith.mulf %506, %450 : vector<1x32xf32>
    %516 = arith.addf %514, %515 : vector<1x32xf32>
    %517 = vector.extract_strided_slice %14 {offsets = [0, 0], sizes = [1, 32], strides = [1, 1]} : vector<8x32xf32> to vector<1x32xf32>
    %518 = vector.extract_strided_slice %15 {offsets = [0, 0], sizes = [1, 32], strides = [1, 1]} : vector<8x32xf32> to vector<1x32xf32>
    %519 = vector.extract_strided_slice %16 {offsets = [0, 0], sizes = [1, 32], strides = [1, 1]} : vector<8x32xf32> to vector<1x32xf32>
    %cst_161 = arith.constant dense<0.000000e+00> : vector<1x384xf32>
    %520 = tpu.matmul %482, %18, %cst_161 {dimension_numbers = #tpu.dot_dimension_numbers<[1], [0], [0], [1], [0, 0, 1, 1], [], []>} : vector<1x32xf32>, vector<32x384xf32>, vector<1x384xf32> -> vector<1x384xf32>
    %521 = vector.extract_strided_slice %520 {offsets = [0, 0], sizes = [1, 32], strides = [1, 1]} : vector<1x384xf32> to vector<1x32xf32>
    %522 = arith.addf %517, %521 : vector<1x32xf32>
    %cst_162 = arith.constant 5.000000e-01 : f32
    %523 = vector.broadcast %cst_162 : f32 to vector<1x32xf32>
    %524 = arith.mulf %523, %522 : vector<1x32xf32>
    %525 = math.tanh %524 : vector<1x32xf32>
    %cst_163 = arith.constant 1.000000e+00 : f32
    %526 = vector.broadcast %cst_163 : f32 to vector<1x32xf32>
    %527 = arith.addf %525, %526 : vector<1x32xf32>
    %cst_164 = arith.constant 5.000000e-01 : f32
    %528 = vector.broadcast %cst_164 : f32 to vector<1x32xf32>
    %529 = arith.mulf %528, %527 : vector<1x32xf32>
    %530 = vector.extract_strided_slice %520 {offsets = [0, 128], sizes = [1, 32], strides = [1, 1]} : vector<1x384xf32> to vector<1x32xf32>
    %531 = arith.addf %518, %530 : vector<1x32xf32>
    %cst_165 = arith.constant 5.000000e-01 : f32
    %532 = vector.broadcast %cst_165 : f32 to vector<1x32xf32>
    %533 = arith.mulf %532, %531 : vector<1x32xf32>
    %534 = math.tanh %533 : vector<1x32xf32>
    %cst_166 = arith.constant 1.000000e+00 : f32
    %535 = vector.broadcast %cst_166 : f32 to vector<1x32xf32>
    %536 = arith.addf %534, %535 : vector<1x32xf32>
    %cst_167 = arith.constant 5.000000e-01 : f32
    %537 = vector.broadcast %cst_167 : f32 to vector<1x32xf32>
    %538 = arith.mulf %537, %536 : vector<1x32xf32>
    %539 = vector.extract_strided_slice %520 {offsets = [0, 256], sizes = [1, 32], strides = [1, 1]} : vector<1x384xf32> to vector<1x32xf32>
    %540 = arith.addf %539, %20 : vector<1x32xf32>
    %541 = arith.mulf %529, %540 : vector<1x32xf32>
    %542 = arith.addf %519, %541 : vector<1x32xf32>
    %543 = math.tanh %542 : vector<1x32xf32>
    %cst_168 = arith.constant 1.000000e+00 : f32
    %544 = vector.broadcast %cst_168 : f32 to vector<1x32xf32>
    %545 = arith.subf %544, %538 : vector<1x32xf32>
    %546 = arith.mulf %545, %543 : vector<1x32xf32>
    %547 = arith.mulf %538, %482 : vector<1x32xf32>
    %548 = arith.addf %546, %547 : vector<1x32xf32>
    %c7_169 = arith.constant 7 : index
    %c0_170 = arith.constant 0 : index
    %549 = vector.load %arg13[%c7_169, %c0_170] : memref<8x32xf32, #tpu.memory_space<vmem>>, vector<1x32xf32>
    tpu.vector_store %arg13[%c7_169, %c0_170], %516 {strides = array<i32>} : memref<8x32xf32, #tpu.memory_space<vmem>>, vector<1x32xf32>,
    %c0_171 = arith.constant 0 : index
    %c0_172 = arith.constant 0 : index
    %550 = vector.load %arg14[%c0_171, %c0_172] : memref<8x32xf32, #tpu.memory_space<vmem>>, vector<1x32xf32>
    tpu.vector_store %arg14[%c0_171, %c0_172], %548 {strides = array<i32>} : memref<8x32xf32, #tpu.memory_space<vmem>>, vector<1x32xf32>,
    %c0_173 = arith.constant 0 : index
    %c0_174 = arith.constant 0 : index
    %551 = vector.load %arg13[%c0_173, %c0_174] : memref<8x32xf32, #tpu.memory_space<vmem>>, vector<8x32xf32>
    %c0_175 = arith.constant 0 : index
    %c0_176 = arith.constant 0 : index
    %552 = vector.load %arg9[%c0_175, %c0_176] : memref<32x2xf32, #tpu.memory_space<vmem>>, vector<32x2xf32>
    %cst_177 = arith.constant dense<0.000000e+00> : vector<8x2xf32>
    %553 = tpu.matmul %551, %552, %cst_177 {dimension_numbers = #tpu.dot_dimension_numbers<[1], [0], [0], [1], [0, 0, 1, 1], [], []>} : vector<8x32xf32>, vector<32x2xf32>, vector<8x2xf32> -> vector<8x2xf32>
    %c0_178 = arith.constant 0 : index
    %c0_179 = arith.constant 0 : index
    %554 = vector.load %arg14[%c0_178, %c0_179] : memref<8x32xf32, #tpu.memory_space<vmem>>, vector<8x32xf32>
    %c0_180 = arith.constant 0 : index
    %c0_181 = arith.constant 0 : index
    %555 = vector.load %arg10[%c0_180, %c0_181] : memref<32x2xf32, #tpu.memory_space<vmem>>, vector<32x2xf32>
    %cst_182 = arith.constant dense<0.000000e+00> : vector<8x2xf32>
    %556 = tpu.matmul %554, %555, %cst_182 {dimension_numbers = #tpu.dot_dimension_numbers<[1], [0], [0], [1], [0, 0, 1, 1], [], []>} : vector<8x32xf32>, vector<32x2xf32>, vector<8x2xf32> -> vector<8x2xf32>
    %557 = arith.addf %553, %556 : vector<8x2xf32>
    %c0_183 = arith.constant 0 : index
    %c0_184 = arith.constant 0 : index
    %558 = vector.load %arg11[%c0_183, %c0_184] : memref<1x2xf32, #tpu.memory_space<vmem>>, vector<1x2xf32>
    %559 = vector.broadcast %558 : vector<1x2xf32> to vector<8x2xf32>
    %560 = arith.addf %557, %559 : vector<8x2xf32>
    %c0_185 = arith.constant 0 : index
    %c0_186 = arith.constant 0 : index
    %561 = vector.load %arg12[%c0_185, %c0_186] : memref<8x2xf32, #tpu.memory_space<vmem>>, vector<8x2xf32>
    tpu.vector_store %arg12[%c0_185, %c0_186], %560 {strides = array<i32>} : memref<8x2xf32, #tpu.memory_space<vmem>>, vector<8x2xf32>,
    return
  }
}

</mosaic_0001>

<bundles_post_ra>
// kernel: bgru_tagger.1
= control target key start
LH: loop header
LB: loop body
LE: loop exit
PB: predicated region body
PF: predicated region fallthrough
CT: control target
= control target key end

     0   :  { %17 = vsyncpa [#allocation5], 0  ;;  %s4959_s0 = inlined_call_operand.vmem [shape: f32[8,2], index: 0, kind: input, shape index: {}]   ;;  %s4960_s1 = inlined_call_operand.vmem [shape: f32[2,384], index: 1, kind: input, shape index: {}]   ;;  %s4961_s2 = inlined_call_operand.vmem [shape: f32[32,384], index: 2, kind: input, shape index: {}]   ;;  %s4962_s3 = inlined_call_operand.hbm [shape: f32[1,384], index: 3, kind: input, shape index: {}]   ;;  %s4963_s4 = inlined_call_operand.hbm [shape: f32[1,32], index: 4, kind: input, shape index: {}]   ;;  %s4964_s5 = inlined_call_operand.vmem [shape: f32[2,384], index: 5, kind: input, shape index: {}]   ;;  %s4965_s6 = inlined_call_operand.hbm [shape: f32[32,384], index: 6, kind: input, shape index: {}]   ;;  %s4966_s7 = inlined_call_operand.hbm [shape: f32[1,384], index: 7, kind: input, shape index: {}]   ;;  %s4967_s8 = inlined_call_operand.hbm [shape: f32[1,32], index: 8, kind: input, shape index: {}]   ;;  %s4968_s9 = inlined_call_operand.vmem [shape: f32[32,2], index: 9, kind: input, shape index: {}]   ;;  %s4969_s10 = inlined_call_operand.vmem [shape: f32[32,2], index: 10, kind: input, shape index: {}]   ;;  %s4970_s11 = inlined_call_operand.hbm [shape: f32[1,2], index: 11, kind: input, shape index: {}]   ;;  %s4971_s12 = inlined_call_operand.vmem [shape: f32[8,2], index: 12, kind: output, shape index: {}]  }
   0x1   :  { %18 = vsyncpa [#allocation7], 0 }
   0x2   :  { %19 = vsyncpa [#allocation10], 0 }
   0x3   :  { %20 = vsyncpa [#allocation13], 0  ;;  %s4293_s21 = smov [#allocation6]   ;;  %s4294_s23 = smov [#allocation9]  }
   0x4   :  { %s43_s22 = sshll.u32 %s4293_s21, 4  ;;  %s67_s24 = sshll.u32 %s4294_s23, 4  ;;  %s44_s22 = int_to_ptr.vmem [resolvable:$true] %s43_s22  ;;  %s68_s24 = int_to_ptr.vmem [resolvable:$true] %s67_s24 }
   0x5   :  { %s4153_s27 = scalar_lea.hbm %s4963_s4, 16 }
   0x6   :  { %p4154_p0 = scmp.ne.s32.totalorder %s4963_s4, %s4153_s27  ;;  %p4157_p1 = scmp.lt.u32.totalorder %s4153_s27, %s4963_s4 }
   0x8   :  { %p4159_p2 = pnand %p4157_p1, %p4154_p0 }
   0xa   :  { %4162 = shalt.err (!%p4159_p2)
}
   0xb   :  { %s4163_s14 = scalar_lea.vmem %s44_s22, 16  ;;  %s4167_s15 = scalar_lea.vmem %s44_s22, 32 }
   0xc   :  { %p4164_p3 = scmp.ne.s32.totalorder %s44_s22, %s4163_s14  ;;  %p4168_p4 = scmp.lt.s32.totalorder %s44_s22, %s44_s22 }
   0xd   :  { %p4169_p5 = scmp.lt.s32.totalorder %s4167_s15, %s4163_s14 }
   0xf   :  { %p4170_p6 = por %p4169_p5, %p4168_p4 }
  0x11   :  { %p4171_p7 = pnand %p4170_p6, %p4164_p3 }
  0x13   :  { %4174 = shalt.err (!%p4171_p7)
}
  0x14   :  { %46 = dma.hbm_to_vmem [thread:$0]  %s4963_s4, 16, %s44_s22, [#allocation7]  }
  0x15   :  { %s4175_s20 = scalar_lea.hbm %s4966_s7, 48 }
  0x16   :  { %p4176_p8 = scmp.ne.s32.totalorder %s4966_s7, %s4175_s20  ;;  %p4179_p9 = scmp.lt.u32.totalorder %s4175_s20, %s4966_s7 }
  0x18   :  { %p4181_p10 = pnand %p4179_p9, %p4176_p8 }
  0x1a   :  { %4184 = shalt.err (!%p4181_p10)
}
  0x1b   :  { %s4185_s27 = scalar_lea.vmem %s68_s24, 48  ;;  %s4189_s28 = scalar_lea.vmem %s68_s24, 64 }
  0x1c   :  { %p4186_p11 = scmp.ne.s32.totalorder %s68_s24, %s4185_s27  ;;  %p4190_p12 = scmp.lt.s32.totalorder %s68_s24, %s68_s24 }
  0x1d   :  { %p4191_p13 = scmp.lt.s32.totalorder %s4189_s28, %s4185_s27 }
  0x1f   :  { %p4192_p0 = por %p4191_p13, %p4190_p12 }
  0x21   :  { %p4193_p1 = pnand %p4192_p0, %p4186_p11 }
  0x23   :  { %4196 = shalt.err (!%p4193_p1)
}
  0x24   :  { %70 = dma.hbm_to_vmem [thread:$0]  %s4966_s7, 48, %s68_s24, [#allocation10]  }
  0x25   :  { %s4295_s29 = smov [#allocation4]   ;;  %s4296_s13 = smov [#allocation8]  }
  0x26   :  { %s33_s30 = sshll.u32 %s4295_s29, 4  ;;  %s54_s14 = sshll.u32 %s4296_s13, 4  ;;  %s34_s30 = int_to_ptr.vmem [resolvable:$true] %s33_s30  ;;  %s4394_s14 = int_to_ptr.vmem [resolvable:$true] %s54_s14 }
  0x27   :  { %s4197_s17 = scalar_lea.hbm %s4962_s3, 48 }
  0x28   :  { %p4198_p2 = scmp.ne.s32.totalorder %s4962_s3, %s4197_s17  ;;  %p4201_p3 = scmp.lt.u32.totalorder %s4197_s17, %s4962_s3 }
  0x2a   :  { %p4203_p4 = pnand %p4201_p3, %p4198_p2 }
  0x2c   :  { %4206 = shalt.err (!%p4203_p4)
}
  0x2d   :  { %s4207_s7 = scalar_lea.vmem %s34_s30, 48  ;;  %s4211_s24 = scalar_lea.vmem %s34_s30, 64 }
  0x2e   :  { %p4208_p5 = scmp.ne.s32.totalorder %s34_s30, %s4207_s7  ;;  %p4212_p6 = scmp.lt.s32.totalorder %s34_s30, %s34_s30 }
  0x2f   :  { %p4213_p7 = scmp.lt.s32.totalorder %s4211_s24, %s4207_s7 }
  0x31   :  { %p4214_p8 = por %p4213_p7, %p4212_p6 }
  0x33   :  { %p4215_p9 = pnand %p4214_p8, %p4208_p5 }
  0x35   :  { %4218 = shalt.err (!%p4215_p9)
}
  0x36   :  { %36 = dma.hbm_to_vmem [thread:$0]  %s4962_s3, 48, %s34_s30, [#allocation5]  }
  0x37   :  { %s4219_s28 = scalar_lea.hbm %s4965_s6, 1536 }
  0x38   :  { %p4220_p10 = scmp.ne.s32.totalorder %s4965_s6, %s4219_s28  ;;  %p4223_p11 = scmp.lt.u32.totalorder %s4219_s28, %s4965_s6 }
  0x3a   :  { %p4225_p12 = pnand %p4223_p11, %p4220_p10 }
  0x3c   :  { %4228 = shalt.err (!%p4225_p12)
}
  0x3d   :  { %s4229_s15 = scalar_lea.vmem %s4394_s14, 1536  ;;  %p4234_p0 = scmp.lt.s32.totalorder %s4394_s14, %s4394_s14 }
  0x3e   :  { %p4230_p13 = scmp.ne.s32.totalorder %s4394_s14, %s4229_s15  ;;  %p4235_p1 = scmp.lt.s32.totalorder %s4229_s15, %s4229_s15 }
  0x40   :  { %p4236_p2 = por %p4235_p1, %p4234_p0 }
  0x42   :  { %p4237_p3 = pnand %p4236_p2, %p4230_p13 }
  0x44   :  { %4240 = shalt.err (!%p4237_p3)
}
  0x45   :  { %s4297_s3 = smov 384   ;;  %s4298_s30 = smov 24  }
  0x46   :  { %60 = dma.hbm_to_vmem [thread:$0]  %s4965_s6, 1536, %s4394_s14, [#allocation7], %s4297_s3, %s4297_s3, %s4298_s30  }
  0x47   :  { %s4299_s18 = smov [#allocation11]   ;;  %s4300_s20 = smov [#allocation12]  }
  0x48   :  { %s77_s19 = sshll.u32 %s4299_s18, 4  ;;  %s91_s21 = sshll.u32 %s4300_s20, 4  ;;  %s78_s19 = int_to_ptr.vmem [resolvable:$true] %s77_s19  ;;  %s92_s21 = int_to_ptr.vmem [resolvable:$true] %s91_s21 }
  0x49   :  { %s4241_s23 = scalar_lea.hbm %s4967_s8, 16 }
  0x4a   :  { %p4242_p4 = scmp.ne.s32.totalorder %s4967_s8, %s4241_s23  ;;  %p4245_p5 = scmp.lt.u32.totalorder %s4241_s23, %s4967_s8 }
  0x4c   :  { %p4247_p6 = pnand %p4245_p5, %p4242_p4 }
  0x4e   :  { %4250 = shalt.err (!%p4247_p6)
}
  0x4f   :  { %s4251_s6 = scalar_lea.vmem %s78_s19, 16  ;;  %s4255_s14 = scalar_lea.vmem %s78_s19, 32 }
  0x50   :  { %p4252_p7 = scmp.ne.s32.totalorder %s78_s19, %s4251_s6  ;;  %p4256_p8 = scmp.lt.s32.totalorder %s78_s19, %s78_s19 }
  0x51   :  { %p4257_p9 = scmp.lt.s32.totalorder %s4255_s14, %s4251_s6 }
  0x53   :  { %p4258_p10 = por %p4257_p9, %p4256_p8 }
  0x55   :  { %p4259_p11 = pnand %p4258_p10, %p4252_p7 }
  0x57   :  { %4262 = shalt.err (!%p4259_p11)
}
  0x58   :  { %80 = dma.hbm_to_vmem [thread:$0]  %s4967_s8, 16, %s78_s19, [#allocation10]  }
  0x59   :  { %s4263_s15 = scalar_lea.hbm %s4970_s11, 16 }
  0x5a   :  { %p4264_p12 = scmp.ne.s32.totalorder %s4970_s11, %s4263_s15  ;;  %p4267_p13 = scmp.lt.u32.totalorder %s4263_s15, %s4970_s11 }
  0x5c   :  { %p4269_p0 = pnand %p4267_p13, %p4264_p12 }
  0x5e   :  { %4272 = shalt.err (!%p4269_p0)
}
  0x5f   :  { %s4273_s18 = scalar_lea.vmem %s92_s21, 16  ;;  %s4277_s20 = scalar_lea.vmem %s92_s21, 32 }
  0x60   :  { %p4274_p1 = scmp.ne.s32.totalorder %s92_s21, %s4273_s18  ;;  %p4278_p2 = scmp.lt.s32.totalorder %s92_s21, %s92_s21 }
  0x61   :  { %p4279_p3 = scmp.lt.s32.totalorder %s4277_s20, %s4273_s18 }
  0x63   :  { %p4280_p4 = por %p4279_p3, %p4278_p2 }
  0x65   :  { %p4281_p5 = pnand %p4280_p4, %p4274_p1 }
  0x67   :  { %4284 = shalt.err (!%p4281_p5)
}
  0x68   :  { %94 = dma.hbm_to_vmem [thread:$0]  %s4970_s11, 16, %s92_s21, [#allocation13]  }
  0x69   :  { %4285 = dma.done.wait [#allocation5], 48  }
  0x6a   :  { %4286 = vsyncadd [#allocation5], 4294967248 }
  0x6b   :  { %4287 = dma.done.wait [#allocation7], 1552  }
  0x6c   :  { %4288 = vsyncadd [#allocation7], 4294965744 }
  0x6d   :  { %4289 = dma.done.wait [#allocation10], 64  }
  0x6e   :  { %4290 = vsyncadd [#allocation10], 4294967232 }
  0x6f   :  { %4291 = dma.done.wait [#allocation13], 16  }
  0x70   :  { %4292 = vsyncadd [#allocation13], 4294967280  ;;  %v117_v0 = vlaneseq  ;;  %v4301_v1 = vmov 1983009808   ;;  %v4302_v3 = vmov 0.0   ;;  %vm4303_vm0 = vmmov 0  }
  0x71   :  { %v135_v2 = vunpack.c.l.s4 %v4301_v1  ;;  %224 = vmatprep.mubr.f32.mxu0 %v4302_v3  ;;  %3597 = vmatprep.subr.mxu1 %v4302_v3  ;;  %v114_v7 = vld [vmem:[%s4960_s1] sm:$0x3f]  ;;  %vm153_vm1 = vcmask 1041408   ;;  %v484_v12 = vld [vmem:[%s4961_s2 + $0x8] sm:$0xff]  ;;  %vm149_vm2 = vcmask 15360   ;;  %v486_v21 = vld [vmem:[%s4961_s2 + $0x18] sm:$0xff] }
  0x72   :  { %v4451_v4 = vshrl.u32 %v117_v0, 7  ;;  %3599 = vmatprep.mubr.msk.f32.mxu1 %vm4303_vm0, %v4302_v3  ;;  %v301_v8 = vld [vmem:[%s4964_s5] sm:$0x3f]  ;;  %v133_v9 = vcombine.high %v114_v7, %v114_v7  ;;  %v490_v22 = vld [vmem:[%s4961_s2 + $0x38] sm:$0xff]  ;;  %v493_v23 = vld [vmem:[%s4961_s2 + $0x50] sm:$0xff]  ;;  %v4304_v40 = vmov 0.0|0.0  }
  0x73   :  { %v136_v5 = vunpack.c.0.s8 %v135_v2  ;;  %v487_v13 = vld [vmem:[%s4961_s2 + $0x20] sm:$0xff]  ;;  %v320_v15 = vcombine.high %v301_v8, %v301_v8  ;;  %v485_v26 = vld [vmem:[%s4961_s2 + $0x10] sm:$0xff]  ;;  %v488_v27 = vld [vmem:[%s4961_s2 + $0x28] sm:$0xff]  ;;  %v4501_v28 = vpack.c.bf16 %v493_v23, %v490_v22  ;;  %vm509_vm3 = vcmask 261120  }
  0x74   :  { %v113_v17 = vld [vmem:[%s4959_s0] sm:$0xff]  ;;  %v4472_v19 = vpack.c.bf16 %v487_v13, %v484_v12  ;;  %v489_v29 = vld [vmem:[%s4961_s2 + $0x30] sm:$0xff]  ;;  %v492_v30 = vld [vmem:[%s4961_s2 + $0x48] sm:$0xff]  ;;  %v4515_v33 = vpack.c.bf16 %v488_v27, %v485_v26  ;;  %v119_v58 = vsub.s32 0, %v4451_v4  ;;  %v123_v63 = vsub.s32 1, %v4451_v4 }
  0x75   :  { %v139_v6 = vsub.s32 %v136_v5, %v4451_v4  ;;  %v483_v20 = vld [vmem:[%s4961_s2] sm:$0xff]  ;;  %v4518_v34 = vpack.c.bf16 %v492_v30, %v489_v29  ;;  %v494_v36 = vld [vmem:[%s4961_s2 + $0x58] sm:$0xff]  ;;  %v505_v42 = vld [vmem:[#allocation8 + $0x50] sm:$0xff]  ;;  %v127_v30 = vsub.s32 2, %v4451_v4  ;;  %vm840_vm4 = vcmask 253952  }
  0x76   :  { %v4492_v25 = vpack.c.bf16 %v486_v21, %v483_v20  ;;  %v496_v31 = vld [vmem:[#allocation8 + $0x8] sm:$0xff]  ;;  %v499_v32 = vld [vmem:[#allocation8 + $0x20] sm:$0xff]  ;;  %v498_v39 = vld [vmem:[#allocation8 + $0x18] sm:$0xff]  ;;  %vm842_vm5 = vcmask 261127   ;;  %vm1191_vm6 = vcmask 254977   ;;  %vm1193_vm7 = vcmask 260102  }
  0x77   :  { %v140_v10 = vrot.slane %v114_v7, %v139_v6  ;;  %v327_v11 = vrot.slane %v301_v8, %v139_v6  ;;  %v147_v18 = vrot.slane %v133_v9, %v139_v6  ;;  %v334_v24 = vrot.slane %v320_v15, %v139_v6  ;;  %v491_v35 = vld [vmem:[%s4961_s2 + $0x40] sm:$0xff]  ;;  %v502_v41 = vld [vmem:[#allocation8 + $0x38] sm:$0xff]  ;;  %v497_v45 = vld [vmem:[#allocation8 + $0x10] sm:$0xff] }
  0x78   :  { %v4528_v37 = vpack.c.bf16 %v499_v32, %v496_v31  ;;  %v495_v38 = vld [vmem:[#allocation8] sm:$0xff]  ;;  %v4533_v43 = vpack.c.bf16 %v494_v36, %v491_v35  ;;  %v500_v46 = vld [vmem:[#allocation8 + $0x28] sm:$0xff]  ;;  %v4542_v47 = vpack.c.bf16 %v505_v42, %v502_v41  ;;  %v501_v48 = vld [vmem:[#allocation8 + $0x30] sm:$0xff]  ;;  %vm1543_vm8 = vcmask 256002  }
  0x79   :  { %v148_v14 = vcombine.high %v140_v10, %v140_v10  ;;  %v335_v16 = vcombine.high %v327_v11, %v327_v11  ;;  %3598 = vmatpush3.msk.msra.mxu1 %vm153_vm1, %v147_v18  ;;  %v4538_v44 = vpack.c.bf16 %v498_v39, %v495_v38  ;;  %v504_v49 = vld [vmem:[#allocation8 + $0x48] sm:$0xff]  ;;  %v4546_v50 = vpack.c.bf16 %v500_v46, %v497_v45  ;;  %v503_v52 = vld [vmem:[#allocation8 + $0x40] sm:$0xff]  ;;  %v506_v53 = vld [vmem:[#allocation8 + $0x58] sm:$0xff] }
  0x7a   :  { %3600 = vmatmul.mubr.msk.f32.vlgmr.msra.gmra.mrb[0].mxu1 %vm149_vm2, %v113_v17  ;;  %3602 = vmatprep.subr.mxu1 %v4302_v3  ;;  %v4549_v51 = vpack.c.bf16 %v504_v49, %v501_v48  ;;  %v4556_v54 = vpack.c.bf16 %v506_v53, %v503_v52  ;;  %v115_v60 = vld [vmem:[#allocation4] sm:$0x7]  ;;  %v4592_v35 = vld [vmem:[#allocation6] sm:$0x1]  ;;  %v4596_v48 = vld [vmem:[#allocation11] sm:$0x1] }
  0x7b   :  { %3462 = vmatprep.subr.msk.mxu0 %vm153_vm1, %v148_v14  ;;  %3604 = vmatprep.mubr.msk.f32.mxu1 %vm4303_vm0, %v4302_v3  ;;  %v120_v0 = vrot.slane %v115_v60, %v119_v58  ;;  %v124_v5 = vrot.slane %v115_v60, %v123_v63  ;;  %v128_v41 = vrot.slane %v115_v60, %v127_v30  ;;  %vm1545_vm9 = vcmask 259077  }
  0x7c   :  { %3463 = vmatpush1.msk.msra.mxu0 %vm153_vm1, %v140_v10  ;;  %3603 = vmatpush3.msk.msra.mxu1 %vm153_vm1, %v334_v24  ;;  %vm1895_vm10 = vcmask 257027   ;;  %vm1897_vm11 = vcmask 258052  }
  0x7d   :  { %3464 = vmatmul.mubr.msk.f32.vlgmr.msra.gmra.mrb[0].mxu0 %vm149_vm2, %v113_v17  ;;  %3467 = vmatprep.subr.msk.mxu0 %vm153_vm1, %v335_v16 }
  0x7e   :  { %3468 = vmatpush1.msk.msra.mxu0 %vm153_vm1, %v327_v11  ;;  %406 = vmatprep.mubr.f32.mxu0 %v4302_v3  ;;  %v302_v11 = vld [vmem:[#allocation9] sm:$0x7] }
  0x7f   :  { %3806 = vmatprep.subr.bf16.mxu0 %v4472_v19  ;;  %3813 = vmatprep.subr.bf16.mxu1 %v4304_v40  ;;  %v307_v16 = vrot.slane %v302_v11, %v119_v58 }
  0x80   :  { %3605 = vmatmul.mubr.msk.f32.vlgmr.msra.gmra.mrb[2].mxu1 %vm149_vm2, %v113_v17 }
  0x81   :  { %3469 = vmatmul.mubr.msk.f32.vlgmr.msra.gmra.mrb[2].mxu0 %vm149_vm2, %v113_v17  ;;  %3815 = vmatpush3.bf16.msra.mxu1 %v4515_v33  ;;  %v311_v17 = vrot.slane %v302_v11, %v123_v63 }
  0x82   :  { %3808 = vmatpush1.bf16.msra.mxu0 %v4492_v25  ;;  %577 = vmatprep.mubr.f32.mxu0 %v4302_v3 }
  0x83   :  { %3810 = vmatprep.subr.bf16.mxu0 %v4501_v28  ;;  %3615 = vmatprep.mubr.msk.f32.mxu1 %vm4303_vm0, %v4302_v3 }
  0x84   :  { %3816 = vmatprep.subr.bf16.mxu1 %v4304_v40 }
  0x85   :  { %3818 = vmatpush3.bf16.msra.mxu1 %v4533_v43 }
  0x86   :  { %3812 = vmatpush1.bf16.msra.mxu0 %v4518_v34  ;;  %3827 = vmatprep.subr.bf16.mxu1 %v4304_v40 }
  0x87   :  { %3820 = vmatprep.subr.bf16.mxu0 %v4528_v37 }
  0x88   :  { %3616 = vmatmul.mubr.f32.vlgmr.msra.gmra.mrb[4].mxu1 %v4302_v3 }
  0x89   :  { %578 = vmatmul.mubr.f32.vlgmr.msra.gmra.mrb[4].mxu0 %v4302_v3  ;;  %3829 = vmatpush3.bf16.msra.mxu1 %v4546_v50 }
  0x8a   :  { %3822 = vmatpush1.bf16.msra.mxu0 %v4538_v44  ;;  %736 = vmatprep.mubr.f32.mxu0 %v4302_v3 }
  0x8b   :  { %3824 = vmatprep.subr.bf16.mxu0 %v4542_v47  ;;  %3626 = vmatprep.mubr.msk.f32.mxu1 %vm4303_vm0, %v4302_v3 }
  0x8c   :  { %3830 = vmatprep.subr.bf16.mxu1 %v4304_v40 }
  0x8d   :  { %3832 = vmatpush3.bf16.msra.mxu1 %v4556_v54 }
  0x8e   :  { %3826 = vmatpush1.bf16.msra.mxu0 %v4549_v51  ;;  %3841 = vmatprep.subr.bf16.mxu1 %v4304_v40 }
  0x8f   :  { %3834 = vmatprep.subr.bf16.mxu0 %v4472_v19 }
  0x90   :  { %3627 = vmatmul.mubr.f32.vlgmr.msra.gmra.mrb[6].mxu1 %v4302_v3 }
  0x91   :  { %737 = vmatmul.mubr.f32.vlgmr.msra.gmra.mrb[6].mxu0 %v4302_v3  ;;  %3843 = vmatpush3.bf16.msra.mxu1 %v4515_v33 }
  0x92   :  { %3836 = vmatpush1.bf16.msra.mxu0 %v4492_v25  ;;  %911 = vmatprep.mubr.f32.mxu0 %v4302_v3 }
  0x93   :  { %3838 = vmatprep.subr.bf16.mxu0 %v4501_v28  ;;  %3637 = vmatprep.mubr.msk.f32.mxu1 %vm4303_vm0, %v4302_v3 }
  0x94   :  { %3844 = vmatprep.subr.bf16.mxu1 %v4304_v40 }
  0x95   :  { %3846 = vmatpush3.bf16.msra.mxu1 %v4533_v43 }
  0x96   :  { %3840 = vmatpush1.bf16.msra.mxu0 %v4518_v34  ;;  %3855 = vmatprep.subr.bf16.mxu1 %v4304_v40 }
  0x97   :  { %3848 = vmatprep.subr.bf16.mxu0 %v4528_v37 }
 0x14d   :  { %v297_v57 = vpop.f32.mrb[0].mxu1 }
 0x14e   :  { %v3601_v59 = vpop.f32.mrb[1].mxu1  ;;  %v4598_v49 = vadd.f32 %v297_v57, %v128_v41 }
 0x14f   :  { %v315_v59 = vrot.slane %v302_v11, %v127_v30 }
 0x150   :  { %v226_v55 = vpop.f32.mrb[0].mxu0 }
 0x151   :  { %v228_v56 = vpop.f32.mrb[1].mxu0  ;;  %v4580_v6 = vadd.f32 %v226_v55, %v120_v0 }
 0x152   :  { %v4583_v10 = vadd.f32 %v228_v56, %v124_v5 }
 0x153   :  { %v479_v1 = vpop.f32.mrb[2].mxu1 }
 0x154   :  { %v408_v61 = vpop.f32.mrb[2].mxu0  ;;  %v3606_v2 = vpop.f32.mrb[3].mxu1  ;;  %v4602_v0 = vadd.f32 %v479_v1, %v315_v59 }
 0x155   :  { %v410_v62 = vpop.f32.mrb[3].mxu0  ;;  %v4586_v21 = vadd.f32 %v408_v61, %v307_v16 }
 0x156   :  { %v4589_v29 = vadd.f32 %v410_v62, %v311_v17 }
 0x15b   :  { %v650_v13 = vpop.f32.mrb[4].mxu1 }
 0x15c   :  { %v579_v7 = vpop.f32.mrb[4].mxu0  ;;  %v3617_v15 = vpop.f32.mrb[5].mxu1  ;;  %v664_v42 = vadd.f32 %v650_v13, %v4592_v35 }
 0x15d   :  { %v654_v8 = vadd.f32 %v579_v7, %v4580_v6  ;;  %v581_v9 = vpop.f32.mrb[5].mxu0 }
 0x15e   :  { %v659_v14 = vadd.f32 %v581_v9, %v4583_v10 }
 0x15f   :  { %v655_v12 = vmul.f32 0.5, %v654_v8 }
 0x160   :  { %v660_v18 = vmul.f32 0.5, %v659_v14 }
 0x161   :  { %4055 = vtanh.f32 %v655_v12 }
 0x162   :  { %4057 = vtanh.f32 %v660_v18 }
 0x163   :  { %v809_v27 = vpop.f32.mrb[6].mxu1 }
 0x164   :  { %v738_v20 = vpop.f32.mrb[6].mxu0  ;;  %v3628_v31 = vpop.f32.mrb[7].mxu1  ;;  %v829_v55 = vadd.f32 %v809_v27, %v4596_v48 }
 0x165   :  { %v814_v22 = vrot.slane %v738_v20, 1  ;;  %v740_v23 = vpop.f32.mrb[7].mxu0 }
 0x166   :  { %v822_v24 = vrot.slane %v740_v23, 1  ;;  %v831_v61 = vrot.slane %v829_v55, 1 }
 0x167   :  { %v816_v26 = vadd.f32 %v814_v22, %v4586_v21 }
 0x168   :  { %v824_v36 = vadd.f32 %v822_v24, %v4589_v29 }
 0x169   :  { %v817_v32 = vmul.f32 0.5, %v816_v26 }
 0x16a   :  { %v825_v45 = vmul.f32 0.5, %v824_v36 }
 0x16b   :  { %v4056_v38 = vpop.eup %4055  ;;  %4059 = vtanh.f32 %v817_v32 }
 0x16c   :  { %v657_v39 = vadd.f32 1.0, %v4056_v38  ;;  %v4058_v4 = vpop.eup %4057  ;;  %4061 = vtanh.f32 %v825_v45 }
 0x16d   :  { %v662_v58 = vadd.f32 1.0, %v4058_v4 }
 0x16e   :  { %v658_v46 = vmul.f32 0.5, %v657_v39 }
 0x16f   :  { %v663_v63 = vmul.f32 0.5, %v662_v58 }
 0x170   :  { %v665_v52 = vmul.f32 %v664_v42, %v658_v46 }
 0x171   :  { %v668_v7 = vsub.f32 1.0, %v663_v63  ;;  %v670_v9 = vmul.f32 0.0, %v663_v63 }
 0x172   :  { %v666_v53 = vadd.f32 %v665_v52, %v4598_v49 }
 0x174   :  { %4063 = vtanh.f32 %v666_v53 }
 0x175   :  { %v4060_v56 = vpop.eup %4059 }
 0x176   :  { %v819_v60 = vadd.f32 1.0, %v4060_v56  ;;  %v4062_v57 = vpop.eup %4061 }
 0x177   :  { %v827_v12 = vadd.f32 1.0, %v4062_v57 }
 0x178   :  { %v820_v62 = vmul.f32 0.5, %v819_v60 }
 0x179   :  { %v828_v11 = vmul.f32 0.5, %v827_v12 }
 0x17a   :  { %v833_v2 = vmul.f32 %v831_v61, %v820_v62 }
 0x17b   :  { %v836_v1 = vsub.f32 1.0, %v828_v11  ;;  %v838_v16 = vmul.f32 0.0, %v828_v11 }
 0x17c   :  { %v834_v5 = vadd.f32 %v833_v2, %v4602_v0 }
 0x17e   :  { %v4064_v8 = vpop.eup %4063  ;;  %4065 = vtanh.f32 %v834_v5 }
 0x17f   :  { %v669_v13 = vmul.f32 %v4064_v8, %v668_v7 }
 0x181   :  { %v4605_v14 = vadd.f32 %v670_v9, %v669_v13 }
 0x183   :  { %3472 = vmatmul.mubr.msk.f32.vlgmr.msra.gmra.mrb[8].mxu0 %vm509_vm3, %v4605_v14  ;;  %3638 = vmatmul.mubr.msk.f32.vlgmr.msra.gmra.mrb[8].mxu1 %vm509_vm3, %v4605_v14  ;;  %841 = vst.msk [vmem:[#allocation2] sm:$0x1] %vm840_vm4, %v4605_v14  ;;  %v1013_v5 = vrot.slane %v4605_v14, 7 }
 0x184   :  { %3850 = vmatpush1.bf16.msra.mxu0 %v4538_v44  ;;  %3857 = vmatpush3.bf16.msra.mxu1 %v4546_v50 }
 0x185   :  { %3852 = vmatprep.subr.bf16.mxu0 %v4542_v47  ;;  %3858 = vmatprep.subr.bf16.mxu1 %v4304_v40 }
 0x186   :  { %1085 = vmatprep.mubr.f32.mxu0 %v4302_v3  ;;  %3648 = vmatprep.mubr.msk.f32.mxu1 %vm4303_vm0, %v4302_v3 }
 0x188   :  { %v4066_v15 = vpop.eup %4065  ;;  %3854 = vmatpush1.bf16.msra.mxu0 %v4549_v51  ;;  %3860 = vmatpush3.bf16.msra.mxu1 %v4556_v54 }
 0x189   :  { %v837_v17 = vmul.f32 %v4066_v15, %v836_v1  ;;  %3862 = vmatprep.subr.bf16.mxu0 %v4472_v19  ;;  %3869 = vmatprep.subr.bf16.mxu1 %v4304_v40 }
 0x18b   :  { %v4624_v18 = vadd.f32 %v838_v16, %v837_v17 }
 0x18d   :  { %v1018_v20 = vrot.slane %v4624_v18, 7  ;;  %843 = vst.msk [vmem:[#allocation3] sm:$0x80] %vm842_vm5, %v4624_v18 }
 0x18f   :  { %3474 = vmatmul.mubr.msk.f32.vlgmr.msra.gmra.mrb[10].mxu0 %vm509_vm3, %v1018_v20  ;;  %3649 = vmatmul.mubr.msk.f32.vlgmr.msra.gmra.mrb[10].mxu1 %vm509_vm3, %v1018_v20 }
 0x190   :  { %3864 = vmatpush1.bf16.msra.mxu0 %v4492_v25  ;;  %3871 = vmatpush3.bf16.msra.mxu1 %v4515_v33 }
 0x191   :  { %3866 = vmatprep.subr.bf16.mxu0 %v4501_v28  ;;  %3872 = vmatprep.subr.bf16.mxu1 %v4304_v40 }
 0x192   :  { %1263 = vmatprep.mubr.f32.mxu0 %v4302_v3  ;;  %3659 = vmatprep.mubr.msk.f32.mxu1 %vm4303_vm0, %v4302_v3 }
 0x194   :  { %3868 = vmatpush1.bf16.msra.mxu0 %v4518_v34  ;;  %3874 = vmatpush3.bf16.msra.mxu1 %v4533_v43 }
 0x195   :  { %3876 = vmatprep.subr.bf16.mxu0 %v4528_v37  ;;  %3883 = vmatprep.subr.bf16.mxu1 %v4304_v40 }
 0x256   :  { %v913_v22 = vpop.f32.mrb[8].mxu0  ;;  %v984_v23 = vpop.f32.mrb[8].mxu1 }
 0x257   :  { %v989_v24 = vrot.slane %v913_v22, 7  ;;  %v915_v26 = vpop.f32.mrb[9].mxu0  ;;  %v3639_v27 = vpop.f32.mrb[9].mxu1  ;;  %v1004_v53 = vadd.f32 %v984_v23, %v4592_v35  ;;  %v1187_v22 = vrot.slane %v4624_v18, 1 }
 0x258   :  { %v997_v30 = vrot.slane %v915_v26, 7 }
 0x259   :  { %v991_v31 = vadd.f32 %v989_v24, %v4580_v6  ;;  %v1006_v2 = vrot.slane %v1004_v53, 7 }
 0x25a   :  { %v999_v32 = vadd.f32 %v997_v30, %v4583_v10 }
 0x25b   :  { %v992_v36 = vmul.f32 0.5, %v991_v31 }
 0x25c   :  { %v1000_v38 = vmul.f32 0.5, %v999_v32 }
 0x25d   :  { %4067 = vtanh.f32 %v992_v36 }
 0x25e   :  { %4069 = vtanh.f32 %v1000_v38 }
 0x262   :  { %v1087_v39 = vpop.f32.mrb[10].mxu0  ;;  %v1158_v41 = vpop.f32.mrb[10].mxu1 }
 0x263   :  { %v1163_v42 = vrot.slane %v1087_v39, 2  ;;  %v1089_v45 = vpop.f32.mrb[11].mxu0  ;;  %v3650_v46 = vpop.f32.mrb[11].mxu1  ;;  %v1178_v12 = vadd.f32 %v1158_v41, %v4596_v48 }
 0x264   :  { %v1171_v52 = vrot.slane %v1089_v45, 2 }
 0x265   :  { %v1165_v4 = vadd.f32 %v1163_v42, %v4586_v21  ;;  %v1180_v17 = vrot.slane %v1178_v12, 2 }
 0x266   :  { %v1173_v55 = vadd.f32 %v1171_v52, %v4589_v29 }
 0x267   :  { %v4068_v56 = vpop.eup %4067  ;;  %v1166_v58 = vmul.f32 0.5, %v1165_v4 }
 0x268   :  { %v4070_v59 = vpop.eup %4069  ;;  %v994_v60 = vadd.f32 1.0, %v4068_v56  ;;  %v1174_v61 = vmul.f32 0.5, %v1173_v55 }
 0x269   :  { %v1002_v62 = vadd.f32 1.0, %v4070_v59  ;;  %4071 = vtanh.f32 %v1166_v58 }
 0x26a   :  { %v995_v63 = vmul.f32 0.5, %v994_v60  ;;  %4073 = vtanh.f32 %v1174_v61 }
 0x26b   :  { %v1003_v57 = vmul.f32 0.5, %v1002_v62 }
 0x26c   :  { %v1008_v7 = vmul.f32 %v1006_v2, %v995_v63 }
 0x26d   :  { %v1015_v8 = vmul.f32 %v1013_v5, %v1003_v57  ;;  %v1011_v24 = vsub.f32 1.0, %v1003_v57 }
 0x26e   :  { %v1009_v9 = vadd.f32 %v1008_v7, %v4598_v49 }
 0x270   :  { %4075 = vtanh.f32 %v1009_v9 }
 0x273   :  { %v4072_v13 = vpop.eup %4071 }
 0x274   :  { %v4074_v11 = vpop.eup %4073  ;;  %v1168_v1 = vadd.f32 1.0, %v4072_v13 }
 0x275   :  { %v1176_v15 = vadd.f32 1.0, %v4074_v11 }
 0x276   :  { %v1169_v16 = vmul.f32 0.5, %v1168_v1 }
 0x277   :  { %v1177_v20 = vmul.f32 0.5, %v1176_v15 }
 0x278   :  { %v1182_v23 = vmul.f32 %v1180_v17, %v1169_v16 }
 0x279   :  { %v1189_v26 = vmul.f32 %v1187_v22, %v1177_v20  ;;  %v1185_v18 = vsub.f32 1.0, %v1177_v20 }
 0x27a   :  { %v4076_v14 = vpop.eup %4075  ;;  %v1183_v27 = vadd.f32 %v1182_v23, %v4602_v0 }
 0x27b   :  { %v1012_v30 = vmul.f32 %v4076_v14, %v1011_v24 }
 0x27c   :  { %4077 = vtanh.f32 %v1183_v27 }
 0x27d   :  { %v4652_v31 = vadd.f32 %v1015_v8, %v1012_v30 }
 0x27f   :  { %1192 = vst.msk [vmem:[#allocation2] sm:$0x2] %vm1191_vm6, %v4652_v31  ;;  %v1196_v32 = vrot.slane %v4652_v31, 1  ;;  %v1365_v22 = vrot.slane %v4652_v31, 7 }
 0x281   :  { %3476 = vmatmul.mubr.msk.f32.vlgmr.msra.gmra.mrb[12].mxu0 %vm509_vm3, %v1196_v32  ;;  %3660 = vmatmul.mubr.msk.f32.vlgmr.msra.gmra.mrb[12].mxu1 %vm509_vm3, %v1196_v32 }
 0x282   :  { %3878 = vmatpush1.bf16.msra.mxu0 %v4538_v44  ;;  %3885 = vmatpush3.bf16.msra.mxu1 %v4546_v50 }
 0x283   :  { %3880 = vmatprep.subr.bf16.mxu0 %v4542_v47  ;;  %3886 = vmatprep.subr.bf16.mxu1 %v4304_v40 }
 0x284   :  { %1437 = vmatprep.mubr.f32.mxu0 %v4302_v3  ;;  %3670 = vmatprep.mubr.msk.f32.mxu1 %vm4303_vm0, %v4302_v3 }
 0x286   :  { %v4078_v36 = vpop.eup %4077  ;;  %3882 = vmatpush1.bf16.msra.mxu0 %v4549_v51  ;;  %3888 = vmatpush3.bf16.msra.mxu1 %v4556_v54 }
 0x287   :  { %v1186_v38 = vmul.f32 %v4078_v36, %v1185_v18  ;;  %3890 = vmatprep.subr.bf16.mxu0 %v4472_v19  ;;  %3897 = vmatprep.subr.bf16.mxu1 %v4304_v40 }
 0x289   :  { %v4670_v39 = vadd.f32 %v1189_v26, %v1186_v38 }
 0x28b   :  { %1194 = vst.msk [vmem:[#allocation3] sm:$0x40] %vm1193_vm7, %v4670_v39  ;;  %v1370_v41 = vrot.slane %v4670_v39, 6 }
 0x28d   :  { %3478 = vmatmul.mubr.msk.f32.vlgmr.msra.gmra.mrb[14].mxu0 %vm509_vm3, %v1370_v41  ;;  %3671 = vmatmul.mubr.msk.f32.vlgmr.msra.gmra.mrb[14].mxu1 %vm509_vm3, %v1370_v41 }
 0x28e   :  { %3892 = vmatpush1.bf16.msra.mxu0 %v4492_v25  ;;  %3899 = vmatpush3.bf16.msra.mxu1 %v4515_v33 }
 0x28f   :  { %3894 = vmatprep.subr.bf16.mxu0 %v4501_v28  ;;  %3900 = vmatprep.subr.bf16.mxu1 %v4304_v40 }
 0x290   :  { %1615 = vmatprep.mubr.f32.mxu0 %v4302_v3  ;;  %3681 = vmatprep.mubr.msk.f32.mxu1 %vm4303_vm0, %v4302_v3 }
 0x292   :  { %3896 = vmatpush1.bf16.msra.mxu0 %v4518_v34  ;;  %3902 = vmatpush3.bf16.msra.mxu1 %v4533_v43 }
 0x293   :  { %3904 = vmatprep.subr.bf16.mxu0 %v4528_v37  ;;  %3911 = vmatprep.subr.bf16.mxu1 %v4304_v40 }
 0x354   :  { %v1265_v42 = vpop.f32.mrb[12].mxu0  ;;  %v1336_v45 = vpop.f32.mrb[12].mxu1 }
 0x355   :  { %v1341_v46 = vrot.slane %v1265_v42, 6  ;;  %v1267_v52 = vpop.f32.mrb[13].mxu0  ;;  %v3661_v4 = vpop.f32.mrb[13].mxu1  ;;  %v1356_v7 = vadd.f32 %v1336_v45, %v4592_v35  ;;  %v1539_v42 = vrot.slane %v4670_v39, 1 }
 0x356   :  { %v1349_v53 = vrot.slane %v1267_v52, 6 }
 0x357   :  { %v1343_v55 = vadd.f32 %v1341_v46, %v4580_v6  ;;  %v1358_v17 = vrot.slane %v1356_v7, 6 }
 0x358   :  { %v1351_v56 = vadd.f32 %v1349_v53, %v4583_v10 }
 0x359   :  { %v1344_v58 = vmul.f32 0.5, %v1343_v55 }
 0x35a   :  { %v1352_v59 = vmul.f32 0.5, %v1351_v56 }
 0x35b   :  { %4079 = vtanh.f32 %v1344_v58 }
 0x35c   :  { %4081 = vtanh.f32 %v1352_v59 }
 0x360   :  { %v1439_v60 = vpop.f32.mrb[14].mxu0  ;;  %v1510_v61 = vpop.f32.mrb[14].mxu1 }
 0x361   :  { %v1515_v62 = vrot.slane %v1439_v60, 3  ;;  %v1441_v63 = vpop.f32.mrb[15].mxu0  ;;  %v3672_v2 = vpop.f32.mrb[15].mxu1  ;;  %v1530_v14 = vadd.f32 %v1510_v61, %v4596_v48 }
 0x362   :  { %v1523_v57 = vrot.slane %v1441_v63, 3 }
 0x363   :  { %v1517_v5 = vadd.f32 %v1515_v62, %v4586_v21  ;;  %v1532_v38 = vrot.slane %v1530_v14, 3 }
 0x364   :  { %v1525_v8 = vadd.f32 %v1523_v57, %v4589_v29 }
 0x365   :  { %v4080_v9 = vpop.eup %4079  ;;  %v1518_v12 = vmul.f32 0.5, %v1517_v5 }
 0x366   :  { %v4082_v13 = vpop.eup %4081  ;;  %v1346_v11 = vadd.f32 1.0, %v4080_v9  ;;  %v1526_v1 = vmul.f32 0.5, %v1525_v8 }
 0x367   :  { %v1354_v15 = vadd.f32 1.0, %v4082_v13  ;;  %4083 = vtanh.f32 %v1518_v12 }
 0x368   :  { %v1347_v16 = vmul.f32 0.5, %v1346_v11  ;;  %4085 = vtanh.f32 %v1526_v1 }
 0x369   :  { %v1355_v20 = vmul.f32 0.5, %v1354_v15 }
 0x36a   :  { %v1360_v23 = vmul.f32 %v1358_v17, %v1347_v16 }
 0x36b   :  { %v1367_v24 = vmul.f32 %v1365_v22, %v1355_v20  ;;  %v1363_v46 = vsub.f32 1.0, %v1355_v20 }
 0x36c   :  { %v1361_v26 = vadd.f32 %v1360_v23, %v4598_v49 }
 0x36e   :  { %4087 = vtanh.f32 %v1361_v26 }
 0x371   :  { %v4084_v27 = vpop.eup %4083 }
 0x372   :  { %v4086_v30 = vpop.eup %4085  ;;  %v1520_v32 = vadd.f32 1.0, %v4084_v27 }
 0x373   :  { %v1528_v18 = vadd.f32 1.0, %v4086_v30 }
 0x374   :  { %v1521_v36 = vmul.f32 0.5, %v1520_v32 }
 0x375   :  { %v1529_v41 = vmul.f32 0.5, %v1528_v18 }
 0x376   :  { %v1534_v45 = vmul.f32 %v1532_v38, %v1521_v36 }
 0x377   :  { %v1541_v52 = vmul.f32 %v1539_v42, %v1529_v41  ;;  %v1537_v39 = vsub.f32 1.0, %v1529_v41 }
 0x378   :  { %v4088_v31 = vpop.eup %4087  ;;  %v1535_v4 = vadd.f32 %v1534_v45, %v4602_v0 }
 0x379   :  { %v1364_v53 = vmul.f32 %v4088_v31, %v1363_v46 }
 0x37a   :  { %4089 = vtanh.f32 %v1535_v4 }
 0x37b   :  { %v4698_v55 = vadd.f32 %v1367_v24, %v1364_v53 }
 0x37d   :  { %1544 = vst.msk [vmem:[#allocation2] sm:$0x4] %vm1543_vm8, %v4698_v55  ;;  %v1548_v56 = vrot.slane %v4698_v55, 2  ;;  %v1717_v42 = vrot.slane %v4698_v55, 7 }
 0x37f   :  { %3480 = vmatmul.mubr.msk.f32.vlgmr.msra.gmra.mrb[16].mxu0 %vm509_vm3, %v1548_v56  ;;  %3682 = vmatmul.mubr.msk.f32.vlgmr.msra.gmra.mrb[16].mxu1 %vm509_vm3, %v1548_v56 }
 0x380   :  { %3906 = vmatpush1.bf16.msra.mxu0 %v4538_v44  ;;  %3913 = vmatpush3.bf16.msra.mxu1 %v4546_v50 }
 0x381   :  { %3908 = vmatprep.subr.bf16.mxu0 %v4542_v47  ;;  %3914 = vmatprep.subr.bf16.mxu1 %v4304_v40 }
 0x382   :  { %1789 = vmatprep.mubr.f32.mxu0 %v4302_v3  ;;  %3692 = vmatprep.mubr.msk.f32.mxu1 %vm4303_vm0, %v4302_v3 }
 0x384   :  { %v4090_v58 = vpop.eup %4089  ;;  %3910 = vmatpush1.bf16.msra.mxu0 %v4549_v51  ;;  %3916 = vmatpush3.bf16.msra.mxu1 %v4556_v54 }
 0x385   :  { %v1538_v59 = vmul.f32 %v4090_v58, %v1537_v39  ;;  %3918 = vmatprep.subr.bf16.mxu0 %v4472_v19  ;;  %3925 = vmatprep.subr.bf16.mxu1 %v4304_v40 }
 0x387   :  { %v4716_v60 = vadd.f32 %v1541_v52, %v1538_v59 }
 0x389   :  { %1546 = vst.msk [vmem:[#allocation3] sm:$0x20] %vm1545_vm9, %v4716_v60  ;;  %v1722_v61 = vrot.slane %v4716_v60, 5 }
 0x38b   :  { %3482 = vmatmul.mubr.msk.f32.vlgmr.msra.gmra.mrb[18].mxu0 %vm509_vm3, %v1722_v61  ;;  %3693 = vmatmul.mubr.msk.f32.vlgmr.msra.gmra.mrb[18].mxu1 %vm509_vm3, %v1722_v61 }
 0x38c   :  { %3920 = vmatpush1.bf16.msra.mxu0 %v4492_v25  ;;  %3927 = vmatpush3.bf16.msra.mxu1 %v4515_v33 }
 0x38d   :  { %3922 = vmatprep.subr.bf16.mxu0 %v4501_v28  ;;  %3928 = vmatprep.subr.bf16.mxu1 %v4304_v40 }
 0x38e   :  { %1967 = vmatprep.mubr.f32.mxu0 %v4302_v3  ;;  %3703 = vmatprep.mubr.msk.f32.mxu1 %vm4303_vm0, %v4302_v3 }
 0x390   :  { %3924 = vmatpush1.bf16.msra.mxu0 %v4518_v34  ;;  %3930 = vmatpush3.bf16.msra.mxu1 %v4533_v43 }
 0x391   :  { %3932 = vmatprep.subr.bf16.mxu0 %v4528_v37  ;;  %3939 = vmatprep.subr.bf16.mxu1 %v4304_v40 }
 0x452   :  { %v1617_v62 = vpop.f32.mrb[16].mxu0  ;;  %v1688_v63 = vpop.f32.mrb[16].mxu1 }
 0x453   :  { %v1693_v2 = vrot.slane %v1617_v62, 5  ;;  %v1619_v57 = vpop.f32.mrb[17].mxu0  ;;  %v3683_v5 = vpop.f32.mrb[17].mxu1  ;;  %v1708_v23 = vadd.f32 %v1688_v63, %v4592_v35  ;;  %v1891_v62 = vrot.slane %v4716_v60, 1 }
 0x454   :  { %v1701_v7 = vrot.slane %v1619_v57, 5 }
 0x455   :  { %v1695_v8 = vadd.f32 %v1693_v2, %v4580_v6  ;;  %v1710_v38 = vrot.slane %v1708_v23, 5 }
 0x456   :  { %v1703_v9 = vadd.f32 %v1701_v7, %v4583_v10 }
 0x457   :  { %v1696_v12 = vmul.f32 0.5, %v1695_v8 }
 0x458   :  { %v1704_v13 = vmul.f32 0.5, %v1703_v9 }
 0x459   :  { %4091 = vtanh.f32 %v1696_v12 }
 0x45a   :  { %4093 = vtanh.f32 %v1704_v13 }
 0x45e   :  { %v1791_v11 = vpop.f32.mrb[18].mxu0  ;;  %v1862_v1 = vpop.f32.mrb[18].mxu1 }
 0x45f   :  { %v1867_v15 = vrot.slane %v1791_v11, 4  ;;  %v1793_v16 = vpop.f32.mrb[19].mxu0  ;;  %v3694_v17 = vpop.f32.mrb[19].mxu1  ;;  %v1882_v31 = vadd.f32 %v1862_v1, %v4596_v48 }
 0x460   :  { %v1875_v20 = vrot.slane %v1793_v16, 4 }
 0x461   :  { %v1869_v22 = vadd.f32 %v1867_v15, %v4586_v21  ;;  %v1884_v59 = vrot.slane %v1882_v31, 4 }
 0x462   :  { %v1877_v24 = vadd.f32 %v1875_v20, %v4589_v29 }
 0x463   :  { %v4092_v26 = vpop.eup %4091  ;;  %v1870_v14 = vmul.f32 0.5, %v1869_v22 }
 0x464   :  { %v4094_v27 = vpop.eup %4093  ;;  %v1698_v30 = vadd.f32 1.0, %v4092_v26  ;;  %v1878_v32 = vmul.f32 0.5, %v1877_v24 }
 0x465   :  { %v1706_v18 = vadd.f32 1.0, %v4094_v27  ;;  %4095 = vtanh.f32 %v1870_v14 }
 0x466   :  { %v1699_v36 = vmul.f32 0.5, %v1698_v30  ;;  %4097 = vtanh.f32 %v1878_v32 }
 0x467   :  { %v1707_v41 = vmul.f32 0.5, %v1706_v18 }
 0x468   :  { %v1712_v45 = vmul.f32 %v1710_v38, %v1699_v36 }
 0x469   :  { %v1719_v46 = vmul.f32 %v1717_v42, %v1707_v41  ;;  %v1715_v2 = vsub.f32 1.0, %v1707_v41 }
 0x46a   :  { %v1713_v52 = vadd.f32 %v1712_v45, %v4598_v49 }
 0x46c   :  { %4099 = vtanh.f32 %v1713_v52 }
 0x46f   :  { %v4096_v4 = vpop.eup %4095 }
 0x470   :  { %v4098_v53 = vpop.eup %4097  ;;  %v1872_v56 = vadd.f32 1.0, %v4096_v4 }
 0x471   :  { %v1880_v39 = vadd.f32 1.0, %v4098_v53 }
 0x472   :  { %v1873_v58 = vmul.f32 0.5, %v1872_v56 }
 0x473   :  { %v1881_v61 = vmul.f32 0.5, %v1880_v39 }
 0x474   :  { %v1886_v63 = vmul.f32 %v1884_v59, %v1873_v58 }
 0x475   :  { %v1893_v57 = vmul.f32 %v1891_v62, %v1881_v61  ;;  %v1889_v60 = vsub.f32 1.0, %v1881_v61 }
 0x476   :  { %v4100_v55 = vpop.eup %4099  ;;  %v1887_v5 = vadd.f32 %v1886_v63, %v4602_v0 }
 0x477   :  { %v1716_v7 = vmul.f32 %v4100_v55, %v1715_v2 }
 0x478   :  { %4101 = vtanh.f32 %v1887_v5 }
 0x479   :  { %v4744_v8 = vadd.f32 %v1719_v46, %v1716_v7 }
 0x47b   :  { %1896 = vst.msk [vmem:[#allocation2] sm:$0x8] %vm1895_vm10, %v4744_v8  ;;  %v1900_v9 = vrot.slane %v4744_v8, 3  ;;  %v2069_v62 = vrot.slane %v4744_v8, 7 }
 0x47d   :  { %3484 = vmatmul.mubr.msk.f32.vlgmr.msra.gmra.mrb[20].mxu0 %vm509_vm3, %v1900_v9  ;;  %3704 = vmatmul.mubr.msk.f32.vlgmr.msra.gmra.mrb[20].mxu1 %vm509_vm3, %v1900_v9 }
 0x47e   :  { %3934 = vmatpush1.bf16.msra.mxu0 %v4538_v44  ;;  %3941 = vmatpush3.bf16.msra.mxu1 %v4546_v50 }
 0x47f   :  { %3936 = vmatprep.subr.bf16.mxu0 %v4542_v47  ;;  %3942 = vmatprep.subr.bf16.mxu1 %v4304_v40 }
 0x480   :  { %2141 = vmatprep.mubr.f32.mxu0 %v4302_v3  ;;  %3714 = vmatprep.mubr.msk.f32.mxu1 %vm4303_vm0, %v4302_v3 }
 0x482   :  { %v4102_v12 = vpop.eup %4101  ;;  %3938 = vmatpush1.bf16.msra.mxu0 %v4549_v51  ;;  %3944 = vmatpush3.bf16.msra.mxu1 %v4556_v54 }
 0x483   :  { %v1890_v13 = vmul.f32 %v4102_v12, %v1889_v60  ;;  %3946 = vmatprep.subr.bf16.mxu0 %v4472_v19  ;;  %3953 = vmatprep.subr.bf16.mxu1 %v4304_v40 }
 0x485   :  { %v4762_v11 = vadd.f32 %v1893_v57, %v1890_v13 }
 0x487   :  { %1898 = vst.msk [vmem:[#allocation3] sm:$0x10] %vm1897_vm11, %v4762_v11  ;;  %v2074_v1 = vrot.slane %v4762_v11, 4 }
 0x489   :  { %3486 = vmatmul.mubr.msk.f32.vlgmr.msra.gmra.mrb[22].mxu0 %vm509_vm3, %v2074_v1  ;;  %3715 = vmatmul.mubr.msk.f32.vlgmr.msra.gmra.mrb[22].mxu1 %vm509_vm3, %v2074_v1 }
 0x48a   :  { %3948 = vmatpush1.bf16.msra.mxu0 %v4492_v25  ;;  %3955 = vmatpush3.bf16.msra.mxu1 %v4515_v33 }
 0x48b   :  { %3950 = vmatprep.subr.bf16.mxu0 %v4501_v28  ;;  %3956 = vmatprep.subr.bf16.mxu1 %v4304_v40 }
 0x48c   :  { %2317 = vmatprep.mubr.f32.mxu0 %v4302_v3  ;;  %3725 = vmatprep.mubr.msk.f32.mxu1 %vm4303_vm0, %v4302_v3 }
 0x48e   :  { %3952 = vmatpush1.bf16.msra.mxu0 %v4518_v34  ;;  %3958 = vmatpush3.bf16.msra.mxu1 %v4533_v43 }
 0x48f   :  { %3960 = vmatprep.subr.bf16.mxu0 %v4528_v37  ;;  %3967 = vmatprep.subr.bf16.mxu1 %v4304_v40 }
 0x550   :  { %v1969_v15 = vpop.f32.mrb[20].mxu0  ;;  %v2040_v16 = vpop.f32.mrb[20].mxu1 }
 0x551   :  { %v2045_v17 = vrot.slane %v1969_v15, 4  ;;  %v1971_v20 = vpop.f32.mrb[21].mxu0  ;;  %v3705_v22 = vpop.f32.mrb[21].mxu1  ;;  %v2060_v45 = vadd.f32 %v2040_v16, %v4592_v35  ;;  %v2243_v15 = vrot.slane %v4762_v11, 1 }
 0x552   :  { %v2053_v23 = vrot.slane %v1971_v20, 4 }
 0x553   :  { %v2047_v24 = vadd.f32 %v2045_v17, %v4580_v6  ;;  %v2062_v59 = vrot.slane %v2060_v45, 4 }
 0x554   :  { %v2055_v26 = vadd.f32 %v2053_v23, %v4583_v10 }
 0x555   :  { %v2048_v14 = vmul.f32 0.5, %v2047_v24 }
 0x556   :  { %v2056_v27 = vmul.f32 0.5, %v2055_v26 }
 0x557   :  { %4103 = vtanh.f32 %v2048_v14 }
 0x558   :  { %4105 = vtanh.f32 %v2056_v27 }
 0x55c   :  { %v2143_v30 = vpop.f32.mrb[22].mxu0  ;;  %v2214_v32 = vpop.f32.mrb[22].mxu1 }
 0x55d   :  { %v2219_v18 = vrot.slane %v2143_v30, 5  ;;  %v2145_v36 = vpop.f32.mrb[23].mxu0  ;;  %v3716_v38 = vpop.f32.mrb[23].mxu1  ;;  %v2234_v55 = vadd.f32 %v2214_v32, %v4596_v48 }
 0x55e   :  { %v2227_v41 = vrot.slane %v2145_v36, 5 }
 0x55f   :  { %v2221_v42 = vadd.f32 %v2219_v18, %v4586_v21  ;;  %v2236_v13 = vrot.slane %v2234_v55, 5 }
 0x560   :  { %v2229_v46 = vadd.f32 %v2227_v41, %v4589_v29 }
 0x561   :  { %v4104_v52 = vpop.eup %4103  ;;  %v2222_v31 = vmul.f32 0.5, %v2221_v42 }
 0x562   :  { %v4106_v4 = vpop.eup %4105  ;;  %v2050_v53 = vadd.f32 1.0, %v4104_v52  ;;  %v2230_v56 = vmul.f32 0.5, %v2229_v46 }
 0x563   :  { %v2058_v39 = vadd.f32 1.0, %v4106_v4  ;;  %4107 = vtanh.f32 %v2222_v31 }
 0x564   :  { %v2051_v58 = vmul.f32 0.5, %v2050_v53  ;;  %4109 = vtanh.f32 %v2230_v56 }
 0x565   :  { %v2059_v61 = vmul.f32 0.5, %v2058_v39 }
 0x566   :  { %v2064_v63 = vmul.f32 %v2062_v59, %v2051_v58 }
 0x567   :  { %v2071_v2 = vmul.f32 %v2069_v62, %v2059_v61  ;;  %v2067_v17 = vsub.f32 1.0, %v2059_v61 }
 0x568   :  { %v2065_v57 = vadd.f32 %v2064_v63, %v4598_v49 }
 0x56a   :  { %4111 = vtanh.f32 %v2065_v57 }
 0x56d   :  { %v4108_v5 = vpop.eup %4107 }
 0x56e   :  { %v4110_v7 = vpop.eup %4109  ;;  %v2224_v9 = vadd.f32 1.0, %v4108_v5 }
 0x56f   :  { %v2232_v60 = vadd.f32 1.0, %v4110_v7 }
 0x570   :  { %v2225_v12 = vmul.f32 0.5, %v2224_v9 }
 0x571   :  { %v2233_v1 = vmul.f32 0.5, %v2232_v60 }
 0x572   :  { %v2238_v16 = vmul.f32 %v2236_v13, %v2225_v12 }
 0x573   :  { %v2245_v20 = vmul.f32 %v2243_v15, %v2233_v1  ;;  %v2241_v11 = vsub.f32 1.0, %v2233_v1 }
 0x574   :  { %v4112_v8 = vpop.eup %4111  ;;  %v2239_v22 = vadd.f32 %v2238_v16, %v4602_v0 }
 0x575   :  { %v2068_v23 = vmul.f32 %v4112_v8, %v2067_v17 }
 0x576   :  { %4113 = vtanh.f32 %v2239_v22 }
 0x577   :  { %v4790_v24 = vadd.f32 %v2071_v2, %v2068_v23 }
 0x579   :  { %2247 = vst.msk [vmem:[#allocation2] sm:$0x10] %vm1897_vm11, %v4790_v24  ;;  %v2250_v26 = vrot.slane %v4790_v24, 4  ;;  %v2419_v15 = vrot.slane %v4790_v24, 7 }
 0x57b   :  { %3488 = vmatmul.mubr.msk.f32.vlgmr.msra.gmra.mrb[24].mxu0 %vm509_vm3, %v2250_v26  ;;  %3726 = vmatmul.mubr.msk.f32.vlgmr.msra.gmra.mrb[24].mxu1 %vm509_vm3, %v2250_v26 }
 0x57c   :  { %3962 = vmatpush1.bf16.msra.mxu0 %v4538_v44  ;;  %3969 = vmatpush3.bf16.msra.mxu1 %v4546_v50 }
 0x57d   :  { %3964 = vmatprep.subr.bf16.mxu0 %v4542_v47  ;;  %3970 = vmatprep.subr.bf16.mxu1 %v4304_v40 }
 0x57e   :  { %2491 = vmatprep.mubr.f32.mxu0 %v4302_v3  ;;  %3736 = vmatprep.mubr.msk.f32.mxu1 %vm4303_vm0, %v4302_v3 }
 0x580   :  { %v4114_v14 = vpop.eup %4113  ;;  %3966 = vmatpush1.bf16.msra.mxu0 %v4549_v51  ;;  %3972 = vmatpush3.bf16.msra.mxu1 %v4556_v54 }
 0x581   :  { %v2242_v27 = vmul.f32 %v4114_v14, %v2241_v11  ;;  %3974 = vmatprep.subr.bf16.mxu0 %v4472_v19  ;;  %3981 = vmatprep.subr.bf16.mxu1 %v4304_v40 }
 0x583   :  { %v4808_v30 = vadd.f32 %v2245_v20, %v2242_v27 }
 0x585   :  { %2248 = vst.msk [vmem:[#allocation3] sm:$0x8] %vm1895_vm10, %v4808_v30  ;;  %v2424_v32 = vrot.slane %v4808_v30, 3 }
 0x587   :  { %3490 = vmatmul.mubr.msk.f32.vlgmr.msra.gmra.mrb[26].mxu0 %vm509_vm3, %v2424_v32  ;;  %3737 = vmatmul.mubr.msk.f32.vlgmr.msra.gmra.mrb[26].mxu1 %vm509_vm3, %v2424_v32  ;;  %v2593_v32 = vrot.slane %v4808_v30, 1 }
 0x588   :  { %3976 = vmatpush1.bf16.msra.mxu0 %v4492_v25  ;;  %3983 = vmatpush3.bf16.msra.mxu1 %v4515_v33 }
 0x589   :  { %3978 = vmatprep.subr.bf16.mxu0 %v4501_v28  ;;  %3984 = vmatprep.subr.bf16.mxu1 %v4304_v40 }
 0x58a   :  { %2667 = vmatprep.mubr.f32.mxu0 %v4302_v3  ;;  %3747 = vmatprep.mubr.msk.f32.mxu1 %vm4303_vm0, %v4302_v3 }
 0x58c   :  { %3980 = vmatpush1.bf16.msra.mxu0 %v4518_v34  ;;  %3986 = vmatpush3.bf16.msra.mxu1 %v4533_v43 }
 0x58d   :  { %3988 = vmatprep.subr.bf16.mxu0 %v4528_v37  ;;  %3995 = vmatprep.subr.bf16.mxu1 %v4304_v40 }
 0x64e   :  { %v2319_v18 = vpop.f32.mrb[24].mxu0  ;;  %v2390_v36 = vpop.f32.mrb[24].mxu1 }
 0x64f   :  { %v2395_v38 = vrot.slane %v2319_v18, 3  ;;  %v2321_v41 = vpop.f32.mrb[25].mxu0  ;;  %v3727_v42 = vpop.f32.mrb[25].mxu1  ;;  %v2410_v63 = vadd.f32 %v2390_v36, %v4592_v35 }
 0x650   :  { %v2403_v45 = vrot.slane %v2321_v41, 3 }
 0x651   :  { %v2397_v46 = vadd.f32 %v2395_v38, %v4580_v6  ;;  %v2412_v13 = vrot.slane %v2410_v63, 3 }
 0x652   :  { %v2405_v52 = vadd.f32 %v2403_v45, %v4583_v10 }
 0x653   :  { %v2398_v31 = vmul.f32 0.5, %v2397_v46 }
 0x654   :  { %v2406_v4 = vmul.f32 0.5, %v2405_v52 }
 0x655   :  { %4115 = vtanh.f32 %v2398_v31 }
 0x656   :  { %4117 = vtanh.f32 %v2406_v4 }
 0x65a   :  { %v2493_v53 = vpop.f32.mrb[26].mxu0  ;;  %v2564_v56 = vpop.f32.mrb[26].mxu1 }
 0x65b   :  { %v2569_v39 = vrot.slane %v2493_v53, 6  ;;  %v2495_v58 = vpop.f32.mrb[27].mxu0  ;;  %v3738_v59 = vpop.f32.mrb[27].mxu1  ;;  %v2584_v35 = vadd.f32 %v2564_v56, %v4596_v48 }
 0x65c   :  { %v2577_v61 = vrot.slane %v2495_v58, 6 }
 0x65d   :  { %v2571_v62 = vadd.f32 %v2569_v39, %v4586_v21  ;;  %v2586_v14 = vrot.slane %v2584_v35, 6 }
 0x65e   :  { %v2579_v2 = vadd.f32 %v2577_v61, %v4589_v29 }
 0x65f   :  { %v4116_v57 = vpop.eup %4115  ;;  %v2572_v55 = vmul.f32 0.5, %v2571_v62 }
 0x660   :  { %v4118_v5 = vpop.eup %4117  ;;  %v2400_v7 = vadd.f32 1.0, %v4116_v57  ;;  %v2580_v9 = vmul.f32 0.5, %v2579_v2 }
 0x661   :  { %v2408_v60 = vadd.f32 1.0, %v4118_v5  ;;  %4119 = vtanh.f32 %v2572_v55  ;;  %v4875_v55 = vld [vmem:[#allocation6] sm:$0x1] }
 0x662   :  { %v2401_v12 = vmul.f32 0.5, %v2400_v7  ;;  %4121 = vtanh.f32 %v2580_v9 }
 0x663   :  { %v2409_v1 = vmul.f32 0.5, %v2408_v60 }
 0x664   :  { %v2414_v16 = vmul.f32 %v2412_v13, %v2401_v12 }
 0x665   :  { %v2421_v17 = vmul.f32 %v2419_v15, %v2409_v1  ;;  %v2417_v36 = vsub.f32 1.0, %v2409_v1 }
 0x666   :  { %v2415_v20 = vadd.f32 %v2414_v16, %v4598_v49 }
 0x668   :  { %4123 = vtanh.f32 %v2415_v20 }
 0x66b   :  { %v4120_v8 = vpop.eup %4119 }
 0x66c   :  { %v4122_v22 = vpop.eup %4121  ;;  %v2574_v23 = vadd.f32 1.0, %v4120_v8 }
 0x66d   :  { %v2582_v26 = vadd.f32 1.0, %v4122_v22 }
 0x66e   :  { %v2575_v11 = vmul.f32 0.5, %v2574_v23 }
 0x66f   :  { %v2583_v27 = vmul.f32 0.5, %v2582_v26  ;;  %v4881_v26 = vld [vmem:[#allocation11] sm:$0x1] }
 0x670   :  { %v2588_v18 = vmul.f32 %v2586_v14, %v2575_v11 }
 0x671   :  { %v2595_v38 = vmul.f32 %v2593_v32, %v2583_v27  ;;  %v2591_v30 = vsub.f32 1.0, %v2583_v27 }
 0x672   :  { %v4124_v24 = vpop.eup %4123  ;;  %v2589_v41 = vadd.f32 %v2588_v18, %v4602_v0 }
 0x673   :  { %v2418_v42 = vmul.f32 %v4124_v24, %v2417_v36 }
 0x674   :  { %4125 = vtanh.f32 %v2589_v41 }
 0x675   :  { %v4836_v45 = vadd.f32 %v2421_v17, %v2418_v42 }
 0x677   :  { %2597 = vst.msk [vmem:[#allocation2] sm:$0x20] %vm1545_vm9, %v4836_v45  ;;  %v2600_v48 = vrot.slane %v4836_v45, 5  ;;  %v2769_v35 = vrot.slane %v4836_v45, 7 }
 0x679   :  { %3492 = vmatmul.mubr.msk.f32.vlgmr.msra.gmra.mrb[28].mxu0 %vm509_vm3, %v2600_v48  ;;  %3748 = vmatmul.mubr.msk.f32.vlgmr.msra.gmra.mrb[28].mxu1 %vm509_vm3, %v2600_v48 }
 0x67a   :  { %3990 = vmatpush1.bf16.msra.mxu0 %v4538_v44  ;;  %3997 = vmatpush3.bf16.msra.mxu1 %v4546_v50 }
 0x67b   :  { %3992 = vmatprep.subr.bf16.mxu0 %v4542_v47  ;;  %3998 = vmatprep.subr.bf16.mxu1 %v4304_v40 }
 0x67c   :  { %2841 = vmatprep.mubr.f32.mxu0 %v4302_v3  ;;  %3758 = vmatprep.mubr.msk.f32.mxu1 %vm4303_vm0, %v4302_v3 }
 0x67e   :  { %v4126_v46 = vpop.eup %4125  ;;  %3994 = vmatpush1.bf16.msra.mxu0 %v4549_v51  ;;  %4000 = vmatpush3.bf16.msra.mxu1 %v4556_v54 }
 0x67f   :  { %v2592_v52 = vmul.f32 %v4126_v46, %v2591_v30  ;;  %4002 = vmatprep.subr.bf16.mxu0 %v4472_v19  ;;  %4009 = vmatprep.subr.bf16.mxu1 %v4304_v40 }
 0x681   :  { %v4854_v31 = vadd.f32 %v2595_v38, %v2592_v52 }
 0x683   :  { %2598 = vst.msk [vmem:[#allocation3] sm:$0x4] %vm1543_vm8, %v4854_v31  ;;  %v2774_v4 = vrot.slane %v4854_v31, 2  ;;  %v2943_v41 = vrot.slane %v4854_v31, 1 }
 0x685   :  { %3494 = vmatmul.mubr.msk.f32.vlgmr.msra.gmra.mrb[30].mxu0 %vm509_vm3, %v2774_v4  ;;  %3759 = vmatmul.mubr.msk.f32.vlgmr.msra.gmra.mrb[30].mxu1 %vm509_vm3, %v2774_v4 }
 0x686   :  { %4004 = vmatpush1.bf16.msra.mxu0 %v4492_v25  ;;  %4011 = vmatpush3.bf16.msra.mxu1 %v4515_v33 }
 0x687   :  { %4006 = vmatprep.subr.bf16.mxu0 %v4501_v28  ;;  %4012 = vmatprep.subr.bf16.mxu1 %v4304_v40 }
 0x688   :  { %3017 = vmatprep.mubr.f32.mxu0 %v4302_v3  ;;  %3769 = vmatprep.mubr.msk.f32.mxu1 %vm4303_vm0, %v4302_v3 }
 0x68a   :  { %4008 = vmatpush1.bf16.msra.mxu0 %v4518_v34  ;;  %4014 = vmatpush3.bf16.msra.mxu1 %v4533_v43 }
 0x68b   :  { %4016 = vmatprep.subr.bf16.mxu0 %v4528_v37  ;;  %4023 = vmatprep.subr.bf16.mxu1 %v4304_v40 }
 0x74c   :  { %v2669_v19 = vpop.f32.mrb[28].mxu0  ;;  %v2740_v25 = vpop.f32.mrb[28].mxu1 }
 0x74d   :  { %v2745_v33 = vrot.slane %v2669_v19, 2  ;;  %v2671_v53 = vpop.f32.mrb[29].mxu0  ;;  %v3749_v28 = vpop.f32.mrb[29].mxu1  ;;  %v2760_v5 = vadd.f32 %v4875_v55, %v2740_v25 }
 0x74e   :  { %v2753_v56 = vrot.slane %v2671_v53, 2  ;;  %v3292_v53 = vld [vmem:[%s4968_s9 + $0x10] sm:$0xff] }
 0x74f   :  { %v2747_v39 = vadd.f32 %v2745_v33, %v4580_v6  ;;  %v2762_v17 = vrot.slane %v2760_v5, 2 }
 0x750   :  { %v2755_v58 = vadd.f32 %v2753_v56, %v4583_v10  ;;  %v3295_v56 = vld [vmem:[%s4969_s10] sm:$0xff] }
 0x751   :  { %v2748_v59 = vmul.f32 0.5, %v2747_v39  ;;  %v3296_v39 = vld [vmem:[%s4969_s10 + $0x8] sm:$0xff] }
 0x752   :  { %v2756_v61 = vmul.f32 0.5, %v2755_v58  ;;  %v4030_v58 = vpack.c.bf16 %v3296_v39, %v3295_v56 }
 0x753   :  { %4127 = vtanh.f32 %v2748_v59  ;;  %v3297_v59 = vld [vmem:[%s4969_s10 + $0x10] sm:$0xff] }
 0x754   :  { %4129 = vtanh.f32 %v2756_v61  ;;  %v3298_v61 = vld [vmem:[%s4969_s10 + $0x18] sm:$0xff] }
 0x758   :  { %v2843_v34 = vpop.f32.mrb[30].mxu0  ;;  %v2914_v43 = vpop.f32.mrb[30].mxu1 }
 0x759   :  { %v2919_v62 = vrot.slane %v2843_v34, 7  ;;  %v2845_v37 = vpop.f32.mrb[31].mxu0  ;;  %v3760_v63 = vpop.f32.mrb[31].mxu1  ;;  %v2934_v11 = vadd.f32 %v4881_v26, %v2914_v43  ;;  %v4033_v34 = vpack.c.bf16 %v3298_v61, %v3297_v59 }
 0x75a   :  { %v2927_v2 = vrot.slane %v2845_v37, 7 }
 0x75b   :  { %v2921_v57 = vadd.f32 %v2919_v62, %v4586_v21  ;;  %v2936_v38 = vrot.slane %v2934_v11, 7 }
 0x75c   :  { %v2929_v7 = vadd.f32 %v2927_v2, %v4589_v29 }
 0x75d   :  { %v4128_v9 = vpop.eup %4127  ;;  %v2922_v60 = vmul.f32 0.5, %v2921_v57 }
 0x75e   :  { %v4130_v12 = vpop.eup %4129  ;;  %v2750_v13 = vadd.f32 1.0, %v4128_v9  ;;  %v2930_v1 = vmul.f32 0.5, %v2929_v7 }
 0x75f   :  { %v2758_v15 = vadd.f32 1.0, %v4130_v12  ;;  %4131 = vtanh.f32 %v2922_v60 }
 0x760   :  { %v2751_v16 = vmul.f32 0.5, %v2750_v13  ;;  %4133 = vtanh.f32 %v2930_v1 }
 0x761   :  { %v2759_v20 = vmul.f32 0.5, %v2758_v15 }
 0x762   :  { %v2764_v8 = vmul.f32 %v2762_v17, %v2751_v16 }
 0x763   :  { %v2771_v22 = vmul.f32 %v2769_v35, %v2759_v20  ;;  %v2767_v45 = vsub.f32 1.0, %v2759_v20 }
 0x764   :  { %v2765_v23 = vadd.f32 %v2764_v8, %v4598_v49 }
 0x766   :  { %4135 = vtanh.f32 %v2765_v23 }
 0x769   :  { %v4132_v14 = vpop.eup %4131 }
 0x76a   :  { %v4134_v27 = vpop.eup %4133  ;;  %v2924_v32 = vadd.f32 1.0, %v4132_v14 }
 0x76b   :  { %v2932_v18 = vadd.f32 1.0, %v4134_v27 }
 0x76c   :  { %v2925_v36 = vmul.f32 0.5, %v2924_v32 }
 0x76d   :  { %v2933_v24 = vmul.f32 0.5, %v2932_v18 }
 0x76e   :  { %v2938_v42 = vmul.f32 %v2936_v38, %v2925_v36 }
 0x76f   :  { %v2945_v48 = vmul.f32 %v2943_v41, %v2933_v24  ;;  %v2941_v31 = vsub.f32 1.0, %v2933_v24 }
 0x770   :  { %v4136_v30 = vpop.eup %4135  ;;  %v2939_v46 = vadd.f32 %v2938_v42, %v4602_v0 }
 0x771   :  { %v2768_v52 = vmul.f32 %v4136_v30, %v2767_v45 }
 0x772   :  { %4137 = vtanh.f32 %v2939_v46 }
 0x773   :  { %v4886_v4 = vadd.f32 %v2771_v22, %v2768_v52 }
 0x775   :  { %2947 = vst.msk [vmem:[#allocation2] sm:$0x40] %vm1193_vm7, %v4886_v4  ;;  %v2950_v19 = vrot.slane %v4886_v4, 6  ;;  %v3119_v27 = vrot.slane %v4886_v4, 7 }
 0x777   :  { %3496 = vmatmul.mubr.msk.f32.vlgmr.msra.gmra.mrb[32].mxu0 %vm509_vm3, %v2950_v19  ;;  %3770 = vmatmul.mubr.msk.f32.vlgmr.msra.gmra.mrb[32].mxu1 %vm509_vm3, %v2950_v19 }
 0x778   :  { %4018 = vmatpush1.bf16.msra.mxu0 %v4538_v44  ;;  %4025 = vmatpush3.bf16.msra.mxu1 %v4546_v50  ;;  %v3290_v50 = vld [vmem:[%s4968_s9] sm:$0xff] }
 0x779   :  { %4020 = vmatprep.subr.bf16.mxu0 %v4542_v47  ;;  %4026 = vmatprep.subr.bf16.mxu1 %v4304_v40 }
 0x77a   :  { %3191 = vmatprep.mubr.f32.mxu0 %v4302_v3  ;;  %3780 = vmatprep.mubr.msk.f32.mxu1 %vm4303_vm0, %v4302_v3 }
 0x77c   :  { %v4138_v25 = vpop.eup %4137  ;;  %4022 = vmatpush1.bf16.msra.mxu0 %v4549_v51  ;;  %4028 = vmatpush3.bf16.msra.mxu1 %v4556_v54  ;;  %v3291_v51 = vld [vmem:[%s4968_s9 + $0x8] sm:$0xff] }
 0x77d   :  { %v2942_v33 = vmul.f32 %v4138_v25, %v2941_v31  ;;  %4035 = vmatprep.subr.bf16.mxu1 %v4304_v40  ;;  %4029 = vmatprep.subr.bf16.mxu0 %v4304_v40  ;;  %v4036_v54 = vpack.c.bf16 %v3291_v51, %v3290_v50 }
 0x77f   :  { %v2946_v44 = vadd.f32 %v2945_v48, %v2942_v33 }
 0x781   :  { %2948 = vst.msk [vmem:[#allocation3] sm:$0x2] %vm1191_vm6, %v2946_v44  ;;  %v4905_v47 = vrot.slane %v2946_v44, 1 }
 0x783   :  { %3498 = vmatmul.mubr.msk.f32.vlgmr.msra.gmra.mrb[34].mxu0 %vm509_vm3, %v4905_v47  ;;  %3781 = vmatmul.mubr.msk.f32.vlgmr.msra.gmra.mrb[34].mxu1 %vm509_vm3, %v4905_v47 }
 0x784   :  { %3802 = vmatprep.mubr.msk.f32.mxu1 %vm4303_vm0, %v4302_v3  ;;  %3791 = vmatprep.mubr.msk.f32.mxu0 %vm4303_vm0, %v4302_v3  ;;  %v3293_v3 = vld [vmem:[%s4968_s9 + $0x18] sm:$0xff] }
 0x785   :  { %4037 = vmatpush3.bf16.msra.mxu1 %v4036_v54  ;;  %v4039_v28 = vpack.c.bf16 %v3293_v3, %v3292_v53  ;;  %4031 = vmatpush3.bf16.msra.mxu0 %v4030_v58  ;;  %v3502_v54 = vld [vmem:[#allocation12] ss:$0 sm:$0xff] }
 0x786   :  { %4038 = vmatprep.subr.bf16.mxu1 %v4304_v40  ;;  %4032 = vmatprep.subr.bf16.mxu0 %v4304_v40 }
 0x789   :  { %4040 = vmatpush3.bf16.msra.mxu1 %v4039_v28  ;;  %4034 = vmatpush3.bf16.msra.mxu0 %v4033_v34 }
 0x84a   :  { %v3019_v43 = vpop.f32.mrb[32].mxu0  ;;  %v3090_v62 = vpop.f32.mrb[32].mxu1 }
 0x84b   :  { %v3095_v37 = vrot.slane %v3019_v43, 1  ;;  %v3021_v63 = vpop.f32.mrb[33].mxu0  ;;  %v3771_v2 = vpop.f32.mrb[33].mxu1  ;;  %v3110_v17 = vadd.f32 %v4875_v55, %v3090_v62 }
 0x84c   :  { %v3103_v57 = vrot.slane %v3021_v63, 1 }
 0x84d   :  { %v3097_v5 = vadd.f32 %v3095_v37, %v4580_v6  ;;  %v3112_v23 = vrot.slane %v3110_v17, 1 }
 0x84e   :  { %v3105_v7 = vadd.f32 %v3103_v57, %v4583_v10 }
 0x84f   :  { %v3098_v9 = vmul.f32 0.5, %v3097_v5 }
 0x850   :  { %v3106_v60 = vmul.f32 0.5, %v3105_v7 }
 0x851   :  { %4139 = vtanh.f32 %v3098_v9 }
 0x852   :  { %4141 = vtanh.f32 %v3106_v60 }
 0x856   :  { %v3193_v12 = vpop.f32.mrb[34].mxu0  ;;  %v3264_v13 = vpop.f32.mrb[34].mxu1 }
 0x857   :  { %v3268_v1 = vadd.f32 %v3193_v12, %v4586_v21  ;;  %v3195_v40 = vpop.f32.mrb[35].mxu0  ;;  %v3782_v15 = vpop.f32.mrb[35].mxu1  ;;  %v3278_v38 = vadd.f32 %v4881_v26, %v3264_v13 }
 0x858   :  { %v3273_v20 = vadd.f32 %v3195_v40, %v4589_v29 }
 0x859   :  { %v3269_v16 = vmul.f32 0.5, %v3268_v1 }
 0x85a   :  { %v3274_v11 = vmul.f32 0.5, %v3273_v20 }
 0x85b   :  { %v4140_v35 = vpop.eup %4139  ;;  %4143 = vtanh.f32 %v3269_v16 }
 0x85c   :  { %v4142_v6 = vpop.eup %4141  ;;  %v3100_v8 = vadd.f32 1.0, %v4140_v35  ;;  %4145 = vtanh.f32 %v3274_v11 }
 0x85d   :  { %v3108_v10 = vadd.f32 1.0, %v4142_v6 }
 0x85e   :  { %v3101_v22 = vmul.f32 0.5, %v3100_v8 }
 0x85f   :  { %v3109_v14 = vmul.f32 0.5, %v3108_v10 }
 0x860   :  { %v3114_v32 = vmul.f32 %v3112_v23, %v3101_v22 }
 0x861   :  { %v3121_v21 = vmul.f32 %v3119_v27, %v3109_v14  ;;  %v3117_v45 = vsub.f32 1.0, %v3109_v14 }
 0x862   :  { %v3115_v18 = vadd.f32 %v3114_v32, %v4598_v49 }
 0x864   :  { %4147 = vtanh.f32 %v3115_v18 }
 0x865   :  { %v4144_v55 = vpop.eup %4143 }
 0x866   :  { %v3271_v36 = vadd.f32 1.0, %v4144_v55  ;;  %v4146_v41 = vpop.eup %4145 }
 0x867   :  { %v3276_v46 = vadd.f32 1.0, %v4146_v41 }
 0x868   :  { %v3272_v29 = vmul.f32 0.5, %v3271_v36 }
 0x869   :  { %v3277_v49 = vmul.f32 0.5, %v3276_v46 }
 0x86a   :  { %v3279_v24 = vmul.f32 %v3278_v38, %v3272_v29 }
 0x86b   :  { %v3282_v4 = vsub.f32 1.0, %v3277_v49  ;;  %v3285_v25 = vmul.f32 %v3277_v49, %v4905_v47 }
 0x86c   :  { %v3280_v42 = vadd.f32 %v3279_v24, %v4602_v0 }
 0x86e   :  { %v4148_v48 = vpop.eup %4147  ;;  %4149 = vtanh.f32 %v3280_v42 }
 0x86f   :  { %v3118_v30 = vmul.f32 %v4148_v48, %v3117_v45 }
 0x871   :  { %v3122_v52 = vadd.f32 %v3121_v21, %v3118_v30 }
 0x873   :  { %3287 = vst.msk [vmem:[#allocation2] sm:$0x80] %vm842_vm5, %v3122_v52 }
 0x878   :  { %v4150_v19 = vpop.eup %4149 }
 0x879   :  { %v3283_v31 = vmul.f32 %v4150_v19, %v3282_v4 }
 0x87a   :  { %v3289_v33 = vld [vmem:[#allocation2] sm:$0xff] }
 0x87b   :  { %v3286_v26 = vadd.f32 %v3285_v25, %v3283_v31  ;;  %3803 = vmatmul.mubr.msk.f32.vlgmr.msra.gmra.mrb[36].mxu1 %vm509_vm3, %v3289_v33 }
 0x87d   :  { %3288 = vst.msk [vmem:[#allocation3] sm:$0x1] %vm840_vm4, %v3286_v26 }
 0x884   :  { %v3294_v0 = vld [vmem:[#allocation3] sm:$0xff] }
 0x885   :  { %3792 = vmatmul.mubr.msk.f32.vlgmr.msra.gmra.mrb[36].mxu0 %vm509_vm3, %v3294_v0 }
 0x94e   :  { %v3441_v44 = vpop.f32.mrb[36].mxu1 }
 0x94f   :  { %v3804_v50 = vpop.f32.mrb[37].mxu1 }
 0x958   :  { %v3368_v51 = vpop.f32.mrb[36].mxu0 }
 0x959   :  { %v3442_v53 = vadd.f32 %v3441_v44, %v3368_v51  ;;  %v3793_v3 = vpop.f32.mrb[37].mxu0 }
 0x95b   :  { %v3452_v28 = vadd.f32 %v3502_v54, %v3442_v53 }
 0x95d   :  { %3453 = vst.msk [vmem:[%s4971_s12] sm:$0xff] %vm149_vm2, %v3452_v28 }
 0x95e   :  { %3458 = vsyncpa [#allocation5], 1 }
 0x95f   :  { %3459 = vsyncpa [#allocation7], 1 }
 0x960   :  { %3460 = vsyncpa [#allocation10], 1 }
 0x961   :  { %3461 = vsyncpa [#allocation13], 1 }

</bundles_post_ra>
